<compile_context>
chip_gen: v7x
topology: tpu7x:2x2x1
jax: 0.10.0
libtpu: 0.0.40
codegen_flags: <defaults>
</compile_context>

<pallas_src>
import math
import functools

import jax
import jax.numpy as jnp
from jax.experimental import pallas as pl
from jax.experimental.pallas import tpu as pltpu


# ---------------------------------------------------------------------------
# Pallas kernel.  One grid step = (batch b, query tile qi, head h).
# ---------------------------------------------------------------------------
def _refined_layer_kernel(
    x_ref, g1_ref, g2_ref,
    wq_ref, wk_ref, wv_ref, wo_ref, w1_ref, w2_ref,
    o_ref,
    hf_cache, k_cache, v_cache, acc_ref,
    *, eps, q_tile, approx_recip):
    """Refs (VMEM blocks):
      x_ref     (S, D)      full residual-stream sequence for this batch elem
      g1/g2     (1, D)      RMSNorm gains (f32)
      wq/wk/wv  (H, D, hd)  per-head projection weights, resident (wq pre-scaled
                            by 1/sqrt(hd)); sliced with w_ref[h] in-kernel
      wo_ref    (H, hd, D)  per-head output projection, resident
      w1_ref    (D, F), w2_ref (F, D)  ReLU-MLP weights, resident
    Scratch:
      hf_cache  (S, D)      rmsnorm(x_full), cached once per batch element
      k_cache   (H, S, hd)  per-head K, cached once per batch element
      v_cache   (H, S, hd)  per-head V, cached once per batch element
      acc_ref   (tq, D)     f32 accumulator: x_q + sum_h attn_h @ wo_h
    """
    qi = pl.program_id(1)
    h = pl.program_id(2)
    cdt = wq_ref.dtype                      # matmul operand dtype (bf16 or f32)
    f32 = jnp.float32

    def rmsnorm(v, g_ref):                  # statistics in f32
        ms = jnp.mean(v * v, axis=-1, keepdims=True)
        return v * jax.lax.rsqrt(ms + eps) * g_ref[...].astype(f32)

    # --- once per batch element: normalize the full sequence (Q/K/V source). --
    @pl.when(jnp.logical_and(qi == 0, h == 0))
    def _():
        hf_cache[...] = rmsnorm(x_ref[...].astype(f32), g1_ref).astype(cdt)

    # --- once per (batch, head): project & cache K/V for this head. ---
    @pl.when(qi == 0)
    def _():
        hf = hf_cache[...]
        k_cache[h] = jnp.dot(hf, wk_ref[h],
                             preferred_element_type=f32).astype(cdt)
        v_cache[h] = jnp.dot(hf, wv_ref[h],
                             preferred_element_type=f32).astype(cdt)

    qs = pl.multiple_of(qi * q_tile, q_tile)

    # --- once per query tile: residual base into the f32 accumulator. ---
    @pl.when(h == 0)
    def _():
        acc_ref[...] = x_ref[pl.ds(qs, q_tile), :].astype(f32)

    # --- per head: q projection, softmax(q k^T) v, accumulate out-projection. -
    hq = hf_cache[pl.ds(qs, q_tile), :]                    # (tq, D), cdt
    q = jnp.dot(hq, wq_ref[h],
                preferred_element_type=f32).astype(cdt)    # (tq, hd), scale folded
    k = k_cache[h]                                         # (S, hd)
    v = v_cache[h]
    s = jnp.einsum("qd,kd->qk", q, k,
                   preferred_element_type=f32)             # (tq, S) f32
    # src_mask is None in this configuration (no additive mask).
    s = s - jnp.max(s, axis=-1, keepdims=True)
    p = jnp.exp(s)                                         # unnormalized
    attn = jnp.dot(p.astype(cdt), v, preferred_element_type=f32)   # (tq, hd)
    # Deferred normalization on the small (tq, hd) tile instead of (tq, S).
    attn = attn * pl.reciprocal(jnp.sum(p, axis=-1, keepdims=True),
                                approx=approx_recip)
    acc_ref[...] += jnp.dot(attn.astype(cdt), wo_ref[h],
                            preferred_element_type=f32)    # dropout1: identity

    # --- last head: attention residual done -> pre-norm ReLU MLP + residual. --
    @pl.when(h == pl.num_programs(2) - 1)
    def _():
        x2 = acc_ref[...]                                  # x + sa(norm1(x))
        h2 = rmsnorm(x2, g2_ref).astype(cdt)
        ff = jnp.dot(h2, w1_ref[...], preferred_element_type=f32)
        ff = jnp.maximum(ff, 0.0).astype(cdt)              # ReLU; dropout: id.
        ff = jnp.dot(ff, w2_ref[...], preferred_element_type=f32)
        o_ref[...] = (x2 + ff).astype(o_ref.dtype)         # dropout2: identity


# ---------------------------------------------------------------------------
# Wrappers
# ---------------------------------------------------------------------------
def refined_layer_pallas_bsd(x_bsd, params, *, nheads, eps=1e-5,
                             compute_dtype=jnp.bfloat16, q_tile=None):
    """Fused RefinedLayer forward on a (batch, seq, d_model) activation."""
    B, S, D = x_bsd.shape
    assert D % nheads == 0
    hd = D // nheads
    F = params["w1"].shape[0]

    cbytes = jnp.zeros((), compute_dtype).dtype.itemsize
    sub = 8 * (4 // cbytes)                 # 8 rows for f32, 16 for bf16
    if q_tile is None:
        q_tile = S if S <= 256 else 256
    assert S % q_tile == 0 and (q_tile == S or q_tile % sub == 0), (
        f"q_tile must divide S={S} and be a multiple of {sub} "
        f"for compute dtype {jnp.dtype(jnp.zeros((), compute_dtype).dtype)}")
    nq = S // q_tile

    cdt = compute_dtype
    scale = 1.0 / math.sqrt(hd)
    # nn.Linear stores (out, in).  Pre-split per head (head-major leading axis)
    # once in the wrapper so the kernel only does full-extent 2-D matmuls.
    # The 1/sqrt(head_dim) softmax scale is folded into wq here (free).
    wq_h = (jnp.transpose(params["wq"].T.reshape(D, nheads, hd), (1, 0, 2))
            * scale).astype(cdt)                                    # (H, D, hd)
    wk_h = jnp.transpose(params["wk"].T.reshape(D, nheads, hd), (1, 0, 2)).astype(cdt)
    wv_h = jnp.transpose(params["wv"].T.reshape(D, nheads, hd), (1, 0, 2)).astype(cdt)
    wo_h = params["wo"].T.reshape(nheads, hd, D).astype(cdt)        # (H, hd, D)
    w1_t = params["w1"].T.astype(cdt)                               # (D, F)
    w2_t = params["w2"].T.astype(cdt)                               # (F, D)
    g1 = params["norm1_g"].reshape(1, D).astype(jnp.float32)
    g2 = params["norm2_g"].reshape(1, D).astype(jnp.float32)

    approx_recip = cbytes < 4               # exact divide on the f32 path
    kernel = functools.partial(_refined_layer_kernel, eps=eps,
                               q_tile=q_tile, approx_recip=approx_recip)

    # VMEM budget estimate (double-buffer inputs/outputs, single scratch).
    xbytes = x_bsd.dtype.itemsize
    est = (
        2 * S * D * xbytes                                    # xfull block
        + 2 * 2 * D * 4                                       # norm gains
        + 2 * (3 * nheads * D * hd + nheads * hd * D) * cbytes  # wq,wk,wv,wo
        + 2 * (D * F + F * D) * cbytes                        # w1, w2
        + 2 * q_tile * D * xbytes                             # output block
        + S * D * cbytes                                      # hf cache
        + 2 * nheads * S * hd * cbytes                        # K/V caches
        + q_tile * D * 4                                      # f32 accumulator
    )
    vmem_limit = min(100 * 1024 * 1024, max(32 * 1024 * 1024, int(est * 1.5)))
    # TODO(synk): on v7x cap this at ~56 MiB and give the constant-index blocks
    # pipeline_mode=pl.Buffered(1) / F-tile the MLP once shapes approach it.

    const2d = lambda shape: pl.BlockSpec(shape, lambda b, qi, h: (0, 0))
    const3d = lambda shape: pl.BlockSpec(shape, lambda b, qi, h: (0, 0, 0))

    out = pl.pallas_call(
        kernel,
        out_shape=jax.ShapeDtypeStruct((B, S, D), x_bsd.dtype),
        grid_spec=pltpu.PrefetchScalarGridSpec(
            num_scalar_prefetch=0,
            grid=(B, nq, nheads),
            in_specs=[
                pl.BlockSpec((None, S, D), lambda b, qi, h: (b, 0, 0)),  # x (full seq)
                const2d((1, D)), const2d((1, D)),                        # norm gains
                const3d((nheads, D, hd)),                                # wq (scaled)
                const3d((nheads, D, hd)),                                # wk
                const3d((nheads, D, hd)),                                # wv
                const3d((nheads, hd, D)),                                # wo
                const2d((D, F)), const2d((F, D)),                        # w1^T, w2^T
            ],
            out_specs=pl.BlockSpec((None, q_tile, D), lambda b, qi, h: (b, qi, 0)),
            scratch_shapes=[
                pltpu.VMEM((S, D), cdt),                 # hf_cache
                pltpu.VMEM((nheads, S, hd), cdt),        # K cache
                pltpu.VMEM((nheads, S, hd), cdt),        # V cache
                pltpu.VMEM((q_tile, D), jnp.float32),    # attention accumulator
            ],
        ),
        compiler_params=pltpu.CompilerParams(
            dimension_semantics=("parallel", "arbitrary", "arbitrary"),
            vmem_limit_bytes=vmem_limit,
        ),
    )(x_bsd, g1, g2, wq_h, wk_h, wv_h, wo_h, w1_t, w2_t)
    return out


def refined_layer_pallas(src, params, *, nheads, eps=1e-5,
                         compute_dtype=jnp.bfloat16, q_tile=None):
    """src: (seq, batch, d_model) — PyTorch RefinedLayer convention.

    If the surrounding model can provide (batch, seq, d_model), call
    refined_layer_pallas_bsd directly to avoid the two activation transposes.
    """
    out = refined_layer_pallas_bsd(jnp.transpose(src, (1, 0, 2)), params,
                                   nheads=nheads, eps=eps,
                                   compute_dtype=compute_dtype, q_tile=q_tile)
    return jnp.transpose(out, (1, 0, 2))


# ---------------------------------------------------------------------------
# Pure-JAX f32 reference (mirrors the PyTorch forward) for the sanity check.
# ---------------------------------------------------------------------------
def refined_layer_ref(src, params, *, nheads, eps=1e-5):
    S, B, D = src.shape
    hd = D // nheads

    def rmsnorm(v, g):
        ms = jnp.mean(v * v, axis=-1, keepdims=True)
        return v * jax.lax.rsqrt(ms + eps) * g

    def attention(q_in, k_in, v_in):
        xq = q_in @ params["wq"].T
        xk = k_in @ params["wk"].T
        xv = v_in @ params["wv"].T
        xq = xq.reshape(S, B, nheads, hd).transpose(1, 2, 0, 3)
        xk = xk.reshape(S, B, nheads, hd).transpose(1, 2, 0, 3)
        xv = xv.reshape(S, B, nheads, hd).transpose(1, 2, 0, 3)
        sc = jnp.einsum("bhqd,bhkd->bhqk", xq, xk) / math.sqrt(hd)
        p = jax.nn.softmax(sc, axis=-1)
        o = jnp.einsum("bhqk,bhkd->bhqd", p, xv)
        o = o.transpose(2, 0, 1, 3).reshape(S, B, D)
        return o @ params["wo"].T

    x = src
    h1 = rmsnorm(x, params["norm1_g"])
    x = x + attention(h1, h1, h1)
    h2 = rmsnorm(x, params["norm2_g"])
    ff = jnp.maximum(h2 @ params["w1"].T, 0.0) @ params["w2"].T
    return x + ff


# ---------------------------------------------------------------------------
if __name__ == "__main__":
    # d_model a multiple of 128 -> lane-dense, unmasked stores; head_dim = 128
    # so per-head caches / weight slices are lane-dense; q_tile=16 gives grid
    # (2, 2, 2) so K/V + hf caching across query tiles and the head-reduction
    # accumulator are all exercised, and satisfies the bf16 16-row packing rule.
    seq, bs, d_model, nhead, dim_ff = 32, 2, 256, 2, 512

    key = jax.random.PRNGKey(0)
    keys = jax.random.split(key, 8)
    wscale = 0.05
    params = {
        "wq": jax.random.normal(keys[0], (d_model, d_model), jnp.float32) * wscale,
        "wk": jax.random.normal(keys[1], (d_model, d_model), jnp.float32) * wscale,
        "wv": jax.random.normal(keys[2], (d_model, d_model), jnp.float32) * wscale,
        "wo": jax.random.normal(keys[3], (d_model, d_model), jnp.float32) * wscale,
        "w1": jax.random.normal(keys[4], (dim_ff, d_model), jnp.float32) * wscale,
        "w2": jax.random.normal(keys[5], (d_model, dim_ff), jnp.float32) * wscale,
        "norm1_g": jnp.ones((d_model,), jnp.float32),
        "norm2_g": jnp.ones((d_model,), jnp.float32),
    }
    src = jax.random.normal(keys[6], (seq, bs, d_model), jnp.float32)

    ref = refined_layer_ref(src, params, nheads=nhead)

    # Exact-math check: f32 matmul operands, exact softmax division (only MXU
    # accumulation order differs from the pure-JAX reference).
    out_f32 = refined_layer_pallas(src, params, nheads=nhead,
                                   compute_dtype=jnp.float32, q_tile=16)
    out_f32 = jax.block_until_ready(out_f32)
    assert out_f32.shape == (seq, bs, d_model)
    assert jnp.allclose(out_f32, ref, atol=5e-3, rtol=5e-3), (
        "f32 kernel mismatch vs reference: max abs err "
        f"{float(jnp.max(jnp.abs(out_f32 - ref)))}")

    # Mixed-precision path (bf16 MXU operands, f32 accumulation) — the
    # configuration the kernel is meant to run in production.
    out_bf16 = refined_layer_pallas(src, params, nheads=nhead, q_tile=16)
    out_bf16 = jax.block_until_ready(out_bf16)
    assert out_bf16.shape == (seq, bs, d_model)
    assert jnp.allclose(out_bf16, ref, atol=5e-2, rtol=5e-2), (
        "bf16 kernel mismatch vs reference: max abs err "
        f"{float(jnp.max(jnp.abs(out_bf16 - ref)))}")

    print("KERNEL_OK")
</pallas_src>

<mosaic_0001>
module attributes {stable_mosaic.version = 11 : i64} {
  func.func @_refined_layer_kernel(%arg0: i32, %arg1: i32, %arg2: i32, %arg3: memref<1x32x256xf32, #tpu.memory_space<vmem>>, %arg4: memref<1x256xf32, #tpu.memory_space<vmem>>, %arg5: memref<1x256xf32, #tpu.memory_space<vmem>>, %arg6: memref<2x256x128xf32, #tpu.memory_space<vmem>>, %arg7: memref<2x256x128xf32, #tpu.memory_space<vmem>>, %arg8: memref<2x256x128xf32, #tpu.memory_space<vmem>>, %arg9: memref<2x128x256xf32, #tpu.memory_space<vmem>>, %arg10: memref<256x512xf32, #tpu.memory_space<vmem>>, %arg11: memref<512x256xf32, #tpu.memory_space<vmem>>, %arg12: memref<1x16x256xf32, #tpu.memory_space<vmem>>, %arg13: memref<32x256xf32, #tpu.memory_space<vmem>>, %arg14: memref<2x32x128xf32, #tpu.memory_space<vmem>>, %arg15: memref<2x32x128xf32, #tpu.memory_space<vmem>>, %arg16: memref<16x256xf32, #tpu.memory_space<vmem>>) attributes {dimension_semantics = [#tpu.dimension_semantics<parallel>, #tpu.dimension_semantics<arbitrary>, #tpu.dimension_semantics<arbitrary>], iteration_bounds = array<i64: 2, 2, 2>, scalar_prefetch = 0 : i64, scratch_operands = 4 : i64, tpu.core_type = #tpu.core_type<tc>, window_params = [{transform_indices = @transform_0, window_bounds = array<i64: 1, 32, 256>}, {pipeline_mode = #tpu.pipeline_mode<synchronous>, transform_indices = @transform_1, window_bounds = array<i64: 1, 256>}, {pipeline_mode = #tpu.pipeline_mode<synchronous>, transform_indices = @transform_2, window_bounds = array<i64: 1, 256>}, {pipeline_mode = #tpu.pipeline_mode<synchronous>, transform_indices = @transform_3, window_bounds = array<i64: 2, 256, 128>}, {pipeline_mode = #tpu.pipeline_mode<synchronous>, transform_indices = @transform_4, window_bounds = array<i64: 2, 256, 128>}, {pipeline_mode = #tpu.pipeline_mode<synchronous>, transform_indices = @transform_5, window_bounds = array<i64: 2, 256, 128>}, {pipeline_mode = #tpu.pipeline_mode<synchronous>, transform_indices = @transform_6, window_bounds = array<i64: 2, 128, 256>}, {pipeline_mode = #tpu.pipeline_mode<synchronous>, transform_indices = @transform_7, window_bounds = array<i64: 256, 512>}, {pipeline_mode = #tpu.pipeline_mode<synchronous>, transform_indices = @transform_8, window_bounds = array<i64: 512, 256>}, {transform_indices = @transform_9, window_bounds = array<i64: 1, 16, 256>}]} {
    %c0_i32 = arith.constant 0 : i32
    %0 = arith.cmpi eq, %arg1, %c0_i32 : i32
    %c0_i32_0 = arith.constant 0 : i32
    %1 = arith.cmpi eq, %arg2, %c0_i32_0 : i32
    %2 = arith.andi %0, %1 : i1
    %3 = arith.extui %2 : i1 to i32
    %c0_i32_1 = arith.constant 0 : i32
    %4 = arith.cmpi ne, %3, %c0_i32_1 : i32
    scf.if %4 {
      %c0_24 = arith.constant 0 : index
      %c0_25 = arith.constant 0 : index
      %c0_26 = arith.constant 0 : index
      %47 = vector.load %arg3[%c0_24, %c0_25, %c0_26] : memref<1x32x256xf32, #tpu.memory_space<vmem>>, vector<1x32x256xf32>
      %48 = vector.shape_cast %47 : vector<1x32x256xf32> to vector<32x256xf32>
      %49 = arith.mulf %48, %48 : vector<32x256xf32>
      %cst_27 = arith.constant dense<0.000000e+00> : vector<32xf32>
      %50 = vector.multi_reduction <add>, %49, %cst_27 [1] : vector<32x256xf32> to vector<32xf32>
      %51 = vector.shape_cast %50 : vector<32xf32> to vector<32x1xf32>
      %cst_28 = arith.constant 2.560000e+02 : f32
      %52 = vector.broadcast %cst_28 : f32 to vector<32x1xf32>
      %53 = arith.divf %51, %52 : vector<32x1xf32>
      %cst_29 = arith.constant 9.99999974E-6 : f32
      %54 = vector.broadcast %cst_29 : f32 to vector<32x1xf32>
      %55 = arith.addf %53, %54 : vector<32x1xf32>
      %56 = math.rsqrt %55 : vector<32x1xf32>
      %57 = vector.broadcast %56 : vector<32x1xf32> to vector<32x256xf32>
      %58 = arith.mulf %48, %57 : vector<32x256xf32>
      %c0_30 = arith.constant 0 : index
      %c0_31 = arith.constant 0 : index
      %59 = vector.load %arg4[%c0_30, %c0_31] : memref<1x256xf32, #tpu.memory_space<vmem>>, vector<1x256xf32>
      %60 = vector.broadcast %59 : vector<1x256xf32> to vector<32x256xf32>
      %61 = arith.mulf %58, %60 : vector<32x256xf32>
      %c0_32 = arith.constant 0 : index
      %c0_33 = arith.constant 0 : index
      %62 = vector.load %arg13[%c0_32, %c0_33] : memref<32x256xf32, #tpu.memory_space<vmem>>, vector<32x256xf32>
      tpu.vector_store %arg13[%c0_32, %c0_33], %61 {strides = array<i32>} : memref<32x256xf32, #tpu.memory_space<vmem>>, vector<32x256xf32>,
    } else {
    }
    %c0_i32_2 = arith.constant 0 : i32
    %5 = arith.cmpi eq, %arg1, %c0_i32_2 : i32
    %6 = arith.extui %5 : i1 to i32
    %c0_i32_3 = arith.constant 0 : i32
    %7 = arith.cmpi ne, %6, %c0_i32_3 : i32
    scf.if %7 {
      %c0_24 = arith.constant 0 : index
      %c0_25 = arith.constant 0 : index
      %47 = vector.load %arg13[%c0_24, %c0_25] : memref<32x256xf32, #tpu.memory_space<vmem>>, vector<32x256xf32>
      %48 = arith.index_cast %arg2 : i32 to index
      %c0_26 = arith.constant 0 : index
      %c0_27 = arith.constant 0 : index
      %49 = vector.load %arg7[%48, %c0_26, %c0_27] : memref<2x256x128xf32, #tpu.memory_space<vmem>>, vector<1x256x128xf32>
      %50 = vector.shape_cast %49 : vector<1x256x128xf32> to vector<256x128xf32>
      %cst_28 = arith.constant dense<0.000000e+00> : vector<32x128xf32>
      %51 = tpu.matmul %47, %50, %cst_28 {dimension_numbers = #tpu.dot_dimension_numbers<[1], [0], [0], [1], [0, 0, 1, 1], [], []>} : vector<32x256xf32>, vector<256x128xf32>, vector<32x128xf32> -> vector<32x128xf32>
      %52 = arith.index_cast %arg2 : i32 to index
      %c0_29 = arith.constant 0 : index
      %c0_30 = arith.constant 0 : index
      %53 = vector.load %arg14[%52, %c0_29, %c0_30] : memref<2x32x128xf32, #tpu.memory_space<vmem>>, vector<1x32x128xf32>
      %54 = vector.shape_cast %53 : vector<1x32x128xf32> to vector<32x128xf32>
      %55 = vector.shape_cast %51 : vector<32x128xf32> to vector<1x32x128xf32>
      tpu.vector_store %arg14[%52, %c0_29, %c0_30], %55 {strides = array<i32>} : memref<2x32x128xf32, #tpu.memory_space<vmem>>, vector<1x32x128xf32>,
      %56 = arith.index_cast %arg2 : i32 to index
      %c0_31 = arith.constant 0 : index
      %c0_32 = arith.constant 0 : index
      %57 = vector.load %arg8[%56, %c0_31, %c0_32] : memref<2x256x128xf32, #tpu.memory_space<vmem>>, vector<1x256x128xf32>
      %58 = vector.shape_cast %57 : vector<1x256x128xf32> to vector<256x128xf32>
      %cst_33 = arith.constant dense<0.000000e+00> : vector<32x128xf32>
      %59 = tpu.matmul %47, %58, %cst_33 {dimension_numbers = #tpu.dot_dimension_numbers<[1], [0], [0], [1], [0, 0, 1, 1], [], []>} : vector<32x256xf32>, vector<256x128xf32>, vector<32x128xf32> -> vector<32x128xf32>
      %60 = arith.index_cast %arg2 : i32 to index
      %c0_34 = arith.constant 0 : index
      %c0_35 = arith.constant 0 : index
      %61 = vector.load %arg15[%60, %c0_34, %c0_35] : memref<2x32x128xf32, #tpu.memory_space<vmem>>, vector<1x32x128xf32>
      %62 = vector.shape_cast %61 : vector<1x32x128xf32> to vector<32x128xf32>
      %63 = vector.shape_cast %59 : vector<32x128xf32> to vector<1x32x128xf32>
      tpu.vector_store %arg15[%60, %c0_34, %c0_35], %63 {strides = array<i32>} : memref<2x32x128xf32, #tpu.memory_space<vmem>>, vector<1x32x128xf32>,
    } else {
    }
    %c16_i32 = arith.constant 16 : i32
    %8 = arith.muli %arg1, %c16_i32 : i32
    %9 = tpu.assume_multiple %8, 16 : i32
    %c0_i32_4 = arith.constant 0 : i32
    %10 = arith.cmpi eq, %arg2, %c0_i32_4 : i32
    %11 = arith.extui %10 : i1 to i32
    %c0_i32_5 = arith.constant 0 : i32
    %12 = arith.cmpi ne, %11, %c0_i32_5 : i32
    scf.if %12 {
      %c0_24 = arith.constant 0 : index
      %47 = arith.index_cast %9 : i32 to index
      %c0_25 = arith.constant 0 : index
      %48 = vector.load %arg3[%c0_24, %47, %c0_25] : memref<1x32x256xf32, #tpu.memory_space<vmem>>, vector<1x16x256xf32>
      %49 = vector.shape_cast %48 : vector<1x16x256xf32> to vector<16x256xf32>
      %c0_26 = arith.constant 0 : index
      %c0_27 = arith.constant 0 : index
      %50 = vector.load %arg16[%c0_26, %c0_27] : memref<16x256xf32, #tpu.memory_space<vmem>>, vector<16x256xf32>
      tpu.vector_store %arg16[%c0_26, %c0_27], %49 {strides = array<i32>} : memref<16x256xf32, #tpu.memory_space<vmem>>, vector<16x256xf32>,
    } else {
    }
    %13 = arith.index_cast %9 : i32 to index
    %c0 = arith.constant 0 : index
    %14 = vector.load %arg13[%13, %c0] : memref<32x256xf32, #tpu.memory_space<vmem>>, vector<16x256xf32>
    %15 = arith.index_cast %arg2 : i32 to index
    %c0_6 = arith.constant 0 : index
    %c0_7 = arith.constant 0 : index
    %16 = vector.load %arg6[%15, %c0_6, %c0_7] : memref<2x256x128xf32, #tpu.memory_space<vmem>>, vector<1x256x128xf32>
    %17 = vector.shape_cast %16 : vector<1x256x128xf32> to vector<256x128xf32>
    %cst = arith.constant dense<0.000000e+00> : vector<16x128xf32>
    %18 = tpu.matmul %14, %17, %cst {dimension_numbers = #tpu.dot_dimension_numbers<[1], [0], [0], [1], [0, 0, 1, 1], [], []>} : vector<16x256xf32>, vector<256x128xf32>, vector<16x128xf32> -> vector<16x128xf32>
    %19 = arith.index_cast %arg2 : i32 to index
    %c0_8 = arith.constant 0 : index
    %c0_9 = arith.constant 0 : index
    %20 = vector.load %arg14[%19, %c0_8, %c0_9] : memref<2x32x128xf32, #tpu.memory_space<vmem>>, vector<1x32x128xf32>
    %21 = vector.shape_cast %20 : vector<1x32x128xf32> to vector<32x128xf32>
    %22 = arith.index_cast %arg2 : i32 to index
    %c0_10 = arith.constant 0 : index
    %c0_11 = arith.constant 0 : index
    %23 = vector.load %arg15[%22, %c0_10, %c0_11] : memref<2x32x128xf32, #tpu.memory_space<vmem>>, vector<1x32x128xf32>
    %24 = vector.shape_cast %23 : vector<1x32x128xf32> to vector<32x128xf32>
    "tpu.trace_start"() <{level = 10 : i32, message = "qd,kd->qk"}> : () -> ()
    %cst_12 = arith.constant dense<0.000000e+00> : vector<16x32xf32>
    %25 = tpu.matmul %18, %21, %cst_12 {dimension_numbers = #tpu.dot_dimension_numbers<[1], [1], [0], [0], [0, 0, 1, 0], [], []>} : vector<16x128xf32>, vector<32x128xf32>, vector<16x32xf32> -> vector<16x32xf32>
    "tpu.trace_stop"() : () -> ()
    %cst_13 = arith.constant dense<0xFF800000> : vector<16xf32>
    %26 = vector.multi_reduction <maximumf>, %25, %cst_13 [1] : vector<16x32xf32> to vector<16xf32>
    %27 = vector.shape_cast %26 : vector<16xf32> to vector<16x1xf32>
    %28 = vector.broadcast %27 : vector<16x1xf32> to vector<16x32xf32>
    %29 = arith.subf %25, %28 : vector<16x32xf32>
    %30 = math.exp %29 : vector<16x32xf32>
    %cst_14 = arith.constant dense<0.000000e+00> : vector<16x128xf32>
    %31 = tpu.matmul %30, %24, %cst_14 {dimension_numbers = #tpu.dot_dimension_numbers<[1], [0], [0], [1], [0, 0, 1, 1], [], []>} : vector<16x32xf32>, vector<32x128xf32>, vector<16x128xf32> -> vector<16x128xf32>
    %cst_15 = arith.constant dense<0.000000e+00> : vector<16xf32>
    %32 = vector.multi_reduction <add>, %30, %cst_15 [1] : vector<16x32xf32> to vector<16xf32>
    %33 = vector.shape_cast %32 : vector<16xf32> to vector<16x1xf32>
    %34 = tpu.reciprocal %33 : vector<16x1xf32> -> vector<16x1xf32>
    %35 = vector.broadcast %34 : vector<16x1xf32> to vector<16x128xf32>
    %36 = arith.mulf %31, %35 : vector<16x128xf32>
    %c0_16 = arith.constant 0 : index
    %c0_17 = arith.constant 0 : index
    %37 = vector.load %arg16[%c0_16, %c0_17] : memref<16x256xf32, #tpu.memory_space<vmem>>, vector<16x256xf32>
    %38 = arith.index_cast %arg2 : i32 to index
    %c0_18 = arith.constant 0 : index
    %c0_19 = arith.constant 0 : index
    %39 = vector.load %arg9[%38, %c0_18, %c0_19] : memref<2x128x256xf32, #tpu.memory_space<vmem>>, vector<1x128x256xf32>
    %40 = vector.shape_cast %39 : vector<1x128x256xf32> to vector<128x256xf32>
    %cst_20 = arith.constant dense<0.000000e+00> : vector<16x256xf32>
    %41 = tpu.matmul %36, %40, %cst_20 {dimension_numbers = #tpu.dot_dimension_numbers<[1], [0], [0], [1], [0, 0, 1, 1], [], []>} : vector<16x128xf32>, vector<128x256xf32>, vector<16x256xf32> -> vector<16x256xf32>
    %42 = arith.addf %37, %41 : vector<16x256xf32>
    %c0_21 = arith.constant 0 : index
    %c0_22 = arith.constant 0 : index
    %43 = vector.load %arg16[%c0_21, %c0_22] : memref<16x256xf32, #tpu.memory_space<vmem>>, vector<16x256xf32>
    tpu.vector_store %arg16[%c0_21, %c0_22], %42 {strides = array<i32>} : memref<16x256xf32, #tpu.memory_space<vmem>>, vector<16x256xf32>,
    %c1_i32 = arith.constant 1 : i32
    %44 = arith.cmpi eq, %arg2, %c1_i32 : i32
    %45 = arith.extui %44 : i1 to i32
    %c0_i32_23 = arith.constant 0 : i32
    %46 = arith.cmpi ne, %45, %c0_i32_23 : i32
    scf.if %46 {
      %c0_24 = arith.constant 0 : index
      %c0_25 = arith.constant 0 : index
      %47 = vector.load %arg16[%c0_24, %c0_25] : memref<16x256xf32, #tpu.memory_space<vmem>>, vector<16x256xf32>
      %48 = arith.mulf %47, %47 : vector<16x256xf32>
      %cst_26 = arith.constant dense<0.000000e+00> : vector<16xf32>
      %49 = vector.multi_reduction <add>, %48, %cst_26 [1] : vector<16x256xf32> to vector<16xf32>
      %50 = vector.shape_cast %49 : vector<16xf32> to vector<16x1xf32>
      %cst_27 = arith.constant 2.560000e+02 : f32
      %51 = vector.broadcast %cst_27 : f32 to vector<16x1xf32>
      %52 = arith.divf %50, %51 : vector<16x1xf32>
      %cst_28 = arith.constant 9.99999974E-6 : f32
      %53 = vector.broadcast %cst_28 : f32 to vector<16x1xf32>
      %54 = arith.addf %52, %53 : vector<16x1xf32>
      %55 = math.rsqrt %54 : vector<16x1xf32>
      %56 = vector.broadcast %55 : vector<16x1xf32> to vector<16x256xf32>
      %57 = arith.mulf %47, %56 : vector<16x256xf32>
      %c0_29 = arith.constant 0 : index
      %c0_30 = arith.constant 0 : index
      %58 = vector.load %arg5[%c0_29, %c0_30] : memref<1x256xf32, #tpu.memory_space<vmem>>, vector<1x256xf32>
      %59 = vector.broadcast %58 : vector<1x256xf32> to vector<16x256xf32>
      %60 = arith.mulf %57, %59 : vector<16x256xf32>
      %c0_31 = arith.constant 0 : index
      %c0_32 = arith.constant 0 : index
      %61 = vector.load %arg10[%c0_31, %c0_32] : memref<256x512xf32, #tpu.memory_space<vmem>>, vector<256x512xf32>
      %cst_33 = arith.constant dense<0.000000e+00> : vector<16x512xf32>
      %62 = tpu.matmul %60, %61, %cst_33 {dimension_numbers = #tpu.dot_dimension_numbers<[1], [0], [0], [1], [0, 0, 1, 1], [], []>} : vector<16x256xf32>, vector<256x512xf32>, vector<16x512xf32> -> vector<16x512xf32>
      %cst_34 = arith.constant 0.000000e+00 : f32
      %63 = vector.broadcast %cst_34 : f32 to vector<16x512xf32>
      %64 = arith.maximumf %62, %63 : vector<16x512xf32>
      %c0_35 = arith.constant 0 : index
      %c0_36 = arith.constant 0 : index
      %65 = vector.load %arg11[%c0_35, %c0_36] : memref<512x256xf32, #tpu.memory_space<vmem>>, vector<512x256xf32>
      %cst_37 = arith.constant dense<0.000000e+00> : vector<16x256xf32>
      %66 = tpu.matmul %64, %65, %cst_37 {dimension_numbers = #tpu.dot_dimension_numbers<[1], [0], [0], [1], [0, 0, 1, 1], [], []>} : vector<16x512xf32>, vector<512x256xf32>, vector<16x256xf32> -> vector<16x256xf32>
      %67 = arith.addf %47, %66 : vector<16x256xf32>
      %c0_38 = arith.constant 0 : index
      %c0_39 = arith.constant 0 : index
      %c0_40 = arith.constant 0 : index
      %68 = vector.load %arg12[%c0_38, %c0_39, %c0_40] : memref<1x16x256xf32, #tpu.memory_space<vmem>>, vector<1x16x256xf32>
      %69 = vector.shape_cast %68 : vector<1x16x256xf32> to vector<16x256xf32>
      %70 = vector.shape_cast %67 : vector<16x256xf32> to vector<1x16x256xf32>
      tpu.vector_store %arg12[%c0_38, %c0_39, %c0_40], %70 {strides = array<i32>} : memref<1x16x256xf32, #tpu.memory_space<vmem>>, vector<1x16x256xf32>,
    } else {
    }
    return
  }
  func.func @transform_0(%arg0: i32, %arg1: i32, %arg2: i32) -> (i32, i32, i32) {
    %c0_i32 = arith.constant 0 : i32
    %c0_i32_0 = arith.constant 0 : i32
    %c0_i32_1 = arith.constant 0 : i32
    return %arg0, %c0_i32, %c0_i32_0 : i32, i32, i32
  }
  func.func @transform_1(%arg0: i32, %arg1: i32, %arg2: i32) -> (i32, i32) {
    %c0_i32 = arith.constant 0 : i32
    %c0_i32_0 = arith.constant 0 : i32
    %c0_i32_1 = arith.constant 0 : i32
    return %c0_i32, %c0_i32_0 : i32, i32
  }
  func.func @transform_2(%arg0: i32, %arg1: i32, %arg2: i32) -> (i32, i32) {
    %c0_i32 = arith.constant 0 : i32
    %c0_i32_0 = arith.constant 0 : i32
    %c0_i32_1 = arith.constant 0 : i32
    return %c0_i32, %c0_i32_0 : i32, i32
  }
  func.func @transform_3(%arg0: i32, %arg1: i32, %arg2: i32) -> (i32, i32, i32) {
    %c0_i32 = arith.constant 0 : i32
    %c0_i32_0 = arith.constant 0 : i32
    %c0_i32_1 = arith.constant 0 : i32
    %c0_i32_2 = arith.constant 0 : i32
    return %c0_i32, %c0_i32_0, %c0_i32_1 : i32, i32, i32
  }
  func.func @transform_4(%arg0: i32, %arg1: i32, %arg2: i32) -> (i32, i32, i32) {
    %c0_i32 = arith.constant 0 : i32
    %c0_i32_0 = arith.constant 0 : i32
    %c0_i32_1 = arith.constant 0 : i32
    %c0_i32_2 = arith.constant 0 : i32
    return %c0_i32, %c0_i32_0, %c0_i32_1 : i32, i32, i32
  }
  func.func @transform_5(%arg0: i32, %arg1: i32, %arg2: i32) -> (i32, i32, i32) {
    %c0_i32 = arith.constant 0 : i32
    %c0_i32_0 = arith.constant 0 : i32
    %c0_i32_1 = arith.constant 0 : i32
    %c0_i32_2 = arith.constant 0 : i32
    return %c0_i32, %c0_i32_0, %c0_i32_1 : i32, i32, i32
  }
  func.func @transform_6(%arg0: i32, %arg1: i32, %arg2: i32) -> (i32, i32, i32) {
    %c0_i32 = arith.constant 0 : i32
    %c0_i32_0 = arith.constant 0 : i32
    %c0_i32_1 = arith.constant 0 : i32
    %c0_i32_2 = arith.constant 0 : i32
    return %c0_i32, %c0_i32_0, %c0_i32_1 : i32, i32, i32
  }
  func.func @transform_7(%arg0: i32, %arg1: i32, %arg2: i32) -> (i32, i32) {
    %c0_i32 = arith.constant 0 : i32
    %c0_i32_0 = arith.constant 0 : i32
    %c0_i32_1 = arith.constant 0 : i32
    return %c0_i32, %c0_i32_0 : i32, i32
  }
  func.func @transform_8(%arg0: i32, %arg1: i32, %arg2: i32) -> (i32, i32) {
    %c0_i32 = arith.constant 0 : i32
    %c0_i32_0 = arith.constant 0 : i32
    %c0_i32_1 = arith.constant 0 : i32
    return %c0_i32, %c0_i32_0 : i32, i32
  }
  func.func @transform_9(%arg0: i32, %arg1: i32, %arg2: i32) -> (i32, i32, i32) {
    %c0_i32 = arith.constant 0 : i32
    %c0_i32_0 = arith.constant 0 : i32
    return %arg0, %arg1, %c0_i32 : i32, i32, i32
  }
}

</mosaic_0001>

<bundles_post_ra>
// kernel: tpu_custom_call.1
= control target key start
LH: loop header
LB: loop body
LE: loop exit
PB: predicated region body
PF: predicated region fallthrough
CT: control target
= control target key end

     0   :  { %s3979_s0 = inlined_call_operand.hbm [shape: f32[2,32,256], index: 0, kind: input, shape index: {}]   ;;  %s3980_s1 = inlined_call_operand.vmem [shape: f32[1,256], index: 1, kind: input, shape index: {}]   ;;  %s3981_s2 = inlined_call_operand.vmem [shape: f32[1,256], index: 2, kind: input, shape index: {}]   ;;  %s3982_s3 = inlined_call_operand.hbm [shape: f32[2,256,128], index: 3, kind: input, shape index: {}]   ;;  %s3983_s4 = inlined_call_operand.hbm [shape: f32[2,256,128], index: 4, kind: input, shape index: {}]   ;;  %s3984_s5 = inlined_call_operand.hbm [shape: f32[2,256,128], index: 5, kind: input, shape index: {}]   ;;  %s3985_s6 = inlined_call_operand.hbm [shape: f32[2,128,256], index: 6, kind: input, shape index: {}]   ;;  %s3986_s7 = inlined_call_operand.hbm [shape: f32[256,512], index: 7, kind: input, shape index: {}]   ;;  %s3987_s8 = inlined_call_operand.hbm [shape: f32[512,256], index: 8, kind: input, shape index: {}]   ;;  %s3988_s9 = inlined_call_operand.hbm [shape: f32[2,32,256], index: 9, kind: output, shape index: {}]  }
   0x1   :  { %4005 = sst [smem:[#allocation31_spill]] %s3979_s0 }
   0x2   :  { %4006 = sst [smem:[#allocation32_spill]] %s3980_s1 }
   0x3   :  { %4007 = sst [smem:[#allocation33_spill]] %s3981_s2 }
   0x4   :  { %4008 = sst [smem:[#allocation34_spill]] %s3982_s3 }
   0x5   :  { %4009 = sst [smem:[#allocation35_spill]] %s3983_s4 }
   0x6   :  { %4010 = sst [smem:[#allocation36_spill]] %s3984_s5 }
   0x7   :  { %4011 = sst [smem:[#allocation37_spill]] %s3985_s6 }
   0x8   :  { %4012 = sst [smem:[#allocation38_spill]] %s3986_s7 }
   0x9   :  { %4013 = sst [smem:[#allocation39_spill]] %s3987_s8 }
   0xa   :  { %4014 = sst [smem:[#allocation40_spill]] %s3988_s9 }
   0xb   :  { %14 = vsyncpa [#allocation7], 0 }
   0xc   :  { %16 = vsyncpa [#allocation7 + $0x1], 0 }
   0xd   :  { %17 = vsyncpa [#allocation10], 0 }
   0xe   :  { %18 = vsyncpa [#allocation13], 0 }
   0xf   :  { %19 = vsyncpa [#allocation16], 0 }
  0x10   :  { %20 = vsyncpa [#allocation8], 0 }
  0x11   :  { %22 = vsyncpa [#allocation8 + $0x1], 0  ;;  %s3304_s30 = smov 0   ;;  %s3306_s10 = smov 0  }
  0x12   :  { %s3308_s11 = smov 0   ;;  %s3310_s12 = smov 0  }
  0x13   :  { %s3312_s13 = smov 0   ;;  %s3314_s14 = smov 0  }
  0x14   :  { %s3316_s15 = smov 0   ;;  %s3318_s16 = smov 0  }
  0x15   :  { %s3320_s17 = smov 0   ;;  %s3322_s18 = smov 0  }
  0x16   :  { %s3324_s19 = smov 0   ;;  %s3326_s20 = smov 0  }
  0x17   :  { %s3328_s21 = smov 0  }
  0x18 LB: > { %4015 = sst [smem:[#allocation24_spill]] %s3187_s30  ;;  %s2062_s22 = sadd.s32 4294967295, %s3235_s21   ;;  %s3235_s21 = sphi %s3328_s21, %s28_s21   ;;  %s3231_s20 = sphi %s3326_s20, %s4083_s20   ;;  %s3227_s19 = sphi %s3324_s19, %s4082_s19   ;;  %s3223_s18 = sphi %s3322_s18, %s4081_s18   ;;  %s3219_s17 = sphi %s3320_s17, %s4080_s17   ;;  %s3215_s16 = sphi %s3318_s16, %s4079_s16   ;;  %s3211_s15 = sphi %s3316_s15, %s4078_s15   ;;  %s3207_s14 = sphi %s3314_s14, %s4077_s14   ;;  %s3203_s13 = sphi %s3312_s13, %s4076_s13   ;;  %s3199_s12 = sphi %s3310_s12, %s4075_s12   ;;  %s3195_s11 = sphi %s3308_s11, %s4074_s11   ;;  %s3191_s10 = sphi %s3306_s10, %s4073_s10   ;;  %s3187_s30 = sphi %s3304_s30, %s4072_s30  }
  0x19   : > { %4016 = sst [smem:[#allocation25_spill]] %s3191_s10  ;;  %p2064_p0 = scmp.ge.s32.totalorder %s3235_s21, 1 }
  0x1a   : > { %4017 = sst [smem:[#allocation26_spill]] %s3211_s15  ;;  %p3371_p1 = scmp.eq.s32.totalorder %s2062_s22, 0 }
  0x1b   : > { %4018 = sst [smem:[#allocation27_spill]] %s3215_s16  ;;  %p3375_p2 = scmp.eq.s32.totalorder %s2062_s22, 7 }
  0x1c   : > { %4019 = sst [smem:[#allocation28_spill]] %s3219_s17  ;;  %p274_p3 = scmp.lt.s32.totalorder %s3235_s21, 9 }
  0x1d   : > { %s4020_s23 = scalar_select %p3371_p1, 1, 0 }
  0x1e   : > { %s4021_s24 = scalar_select %p3375_p2, 1, 0 }
  0x1f   : > { %p3380_p4 = pnand %p2064_p0, %p274_p3  ;;  %s3237_s26 = smov [#allocation9]  }
  0x20   : > { %4022 = sst [smem:[#allocation29_spill]] %s4021_s24  ;;  %s292_s27 = sshll.u32 %s3237_s26, 4  ;;  %s3384_s27 = int_to_ptr.vmem [resolvable:$true] %s292_s27 }
  0x21   : > { %s4023_s25 = scalar_select %p3380_p4, 1, 0 }
  0x22   : > { %p2703_p5 = pneg %p3380_p4  ;;  %s3238_s29 = smov [#allocation12]  }
  0x23   : > { %4024 = sst [smem:[#allocation30_spill]] %s4023_s25  ;;  %s318_s22 = sshll.u32 %s3238_s29, 4  ;;  %s3394_s22 = int_to_ptr.vmem [resolvable:$true] %s318_s22 }
  0x24   : > { %p3390_p6 = pnand %p2703_p5, %p3371_p1  ;;  %s3239_s9 = smov [#allocation15]  }
  0x25   : > { %s344_s17 = sshll.u32 %s3239_s9, 4  ;;  %s4026_s3 = sld [smem:[#allocation34_spill]]  ;;  %s3396_s17 = int_to_ptr.vmem [resolvable:$true] %s344_s17 }
  0x26   : > { %p3406_p8 = pneg %p3390_p6 }
  0x2b   : > { %s2887_s1 = scalar_lea.hbm %s4026_s3, 8192 }
  0x2c   : > { %p2888_p7 = scmp.ne.s32.totalorder %s4026_s3, %s2887_s1  ;;  %p2894_p11 = scmp.lt.u32.totalorder %s2887_s1, %s4026_s3 }
  0x2e   : > { %p2890_p9 = pnand %p3406_p8, %p2888_p7 }
  0x30   : > { %p2891_p10 = pneg %p2890_p9 }
  0x32   : > { %p2896_p12 = pnand %p2894_p11, %p2891_p10 }
  0x34   : > { %2899 = shalt.err (!%p2896_p12)
}
  0x35   : > { %s2900_s2 = scalar_lea.vmem %s3384_s27, 8192  ;;  %p2908_p5 = scmp.lt.s32.totalorder %s3384_s27, %s3384_s27 }
  0x36   : > { %p2901_p13 = scmp.ne.s32.totalorder %s3384_s27, %s2900_s2  ;;  %p2909_p4 = scmp.lt.s32.totalorder %s2900_s2, %s2900_s2 }
  0x38   : > { %p2903_p0 = pnand %p2901_p13, %p3406_p8  ;;  %p2910_p7 = por %p2909_p4, %p2908_p5 }
  0x3a   : > { %p2904_p3 = pneg %p2903_p0 }
  0x3c   : > { %p2911_p9 = pnand %p2910_p7, %p2904_p3 }
  0x3e   : > { %2914 = shalt.err (!%p2911_p9)
}
  0x3f   : > { %s3998_s15 = smov 128   ;;  %s3999_s1 = smov 8  }
  0x40   : > { %2706 = dma.hbm_to_vmem [thread:$0]  (!%p3390_p6), %s4026_s3, 8192, %s3384_s27, [#allocation10], %s3998_s15, %s3998_s15, %s3999_s1  }
  0x41   : > { %s4028_s5 = sld [smem:[#allocation36_spill]] }
  0x47   : > { %s2915_s2 = scalar_lea.hbm %s4028_s5, 8192 }
  0x48   : > { %p2916_p4 = scmp.ne.s32.totalorder %s4028_s5, %s2915_s2  ;;  %p2922_p12 = scmp.lt.u32.totalorder %s2915_s2, %s4028_s5 }
  0x4a   : > { %p2918_p10 = pnand %p2916_p4, %p3406_p8 }
  0x4c   : > { %p2919_p11 = pneg %p2918_p10 }
  0x4e   : > { %p2924_p13 = pnand %p2922_p12, %p2919_p11 }
  0x50   : > { %2927 = shalt.err (!%p2924_p13)
}
  0x51   : > { %s2928_s27 = scalar_lea.vmem %s3394_s22, 8192  ;;  %p2936_p7 = scmp.lt.s32.totalorder %s3394_s22, %s3394_s22 }
  0x52   : > { %p2929_p0 = scmp.ne.s32.totalorder %s3394_s22, %s2928_s27  ;;  %p2937_p9 = scmp.lt.s32.totalorder %s2928_s27, %s2928_s27 }
  0x54   : > { %p2931_p3 = pnand %p2929_p0, %p3406_p8  ;;  %p2938_p4 = por %p2937_p9, %p2936_p7 }
  0x56   : > { %p2932_p5 = pneg %p2931_p3 }
  0x58   : > { %p2939_p10 = pnand %p2938_p4, %p2932_p5 }
  0x5a   : > { %2942 = shalt.err (!%p2939_p10)
}
  0x5b   : > { %2712 = dma.hbm_to_vmem [thread:$0]  (!%p3390_p6), %s4028_s5, 8192, %s3394_s22, [#allocation13], %s3998_s15, %s3998_s15, %s3999_s1  }
  0x5c   : > { %s4029_s7 = sld [smem:[#allocation38_spill]] }
  0x62   : > { %s2943_s16 = scalar_lea.hbm %s4029_s7, 16384 }
  0x63   : > { %p2944_p11 = scmp.ne.s32.totalorder %s4029_s7, %s2943_s16  ;;  %p2950_p0 = scmp.lt.u32.totalorder %s2943_s16, %s4029_s7 }
  0x65   : > { %p2946_p12 = pnand %p2944_p11, %p3406_p8 }
  0x67   : > { %p2947_p13 = pneg %p2946_p12 }
  0x69   : > { %p2952_p3 = pnand %p2950_p0, %p2947_p13 }
  0x6b   : > { %2955 = shalt.err (!%p2952_p3)
}
  0x6c   : > { %s2956_s22 = scalar_lea.vmem %s3396_s17, 16384  ;;  %p2964_p4 = scmp.lt.s32.totalorder %s3396_s17, %s3396_s17 }
  0x6d   : > { %p2957_p5 = scmp.ne.s32.totalorder %s3396_s17, %s2956_s22  ;;  %p2965_p10 = scmp.lt.s32.totalorder %s2956_s22, %s2956_s22 }
  0x6f   : > { %p2959_p7 = pnand %p2957_p5, %p3406_p8  ;;  %p2966_p11 = por %p2965_p10, %p2964_p4 }
  0x71   : > { %p2960_p9 = pneg %p2959_p7 }
  0x73   : > { %p2967_p12 = pnand %p2966_p11, %p2960_p9 }
  0x75   : > { %2970 = shalt.err (!%p2967_p12)
}
  0x76   : > { %s3242_s27 = smov 512   ;;  %s3243_s0 = smov 32  }
  0x77   : > { %2718 = dma.hbm_to_vmem [thread:$0]  (!%p3390_p6), %s4029_s7, 16384, %s3396_s17, [#allocation16], %s3242_s27, %s3242_s27, %s3243_s0  }
  0x78   : > { %s3244_s24 = smov [#allocation11]   ;;  %s3245_s26 = smov [#allocation14]  }
  0x79   : > { %s305_s16 = sshll.u32 %s3244_s24, 4  ;;  %s331_s9 = sshll.u32 %s3245_s26, 4  ;;  %s306_s16 = int_to_ptr.vmem [resolvable:$true] %s305_s16  ;;  %s3479_s9 = int_to_ptr.vmem [resolvable:$true] %s331_s9 }
  0x7a   : > { %s4030_s4 = sld [smem:[#allocation35_spill]] }
  0x80   : > { %s2971_s22 = scalar_lea.hbm %s4030_s4, 8192 }
  0x81   : > { %p2972_p13 = scmp.ne.s32.totalorder %s4030_s4, %s2971_s22  ;;  %p2978_p5 = scmp.lt.u32.totalorder %s2971_s22, %s4030_s4 }
  0x83   : > { %p2974_p0 = pnand %p2972_p13, %p3406_p8 }
  0x85   : > { %p2975_p3 = pneg %p2974_p0 }
  0x87   : > { %p2980_p7 = pnand %p2978_p5, %p2975_p3 }
  0x89   : > { %2983 = shalt.err (!%p2980_p7)
}
  0x8a   : > { %s2984_s27 = scalar_lea.vmem %s306_s16, 8192  ;;  %p2992_p11 = scmp.lt.s32.totalorder %s306_s16, %s306_s16 }
  0x8b   : > { %p2985_p9 = scmp.ne.s32.totalorder %s306_s16, %s2984_s27  ;;  %p2993_p12 = scmp.lt.s32.totalorder %s2984_s27, %s2984_s27 }
  0x8d   : > { %p2987_p4 = pnand %p2985_p9, %p3406_p8  ;;  %p2994_p2 = por %p2993_p12, %p2992_p11 }
  0x8f   : > { %p2988_p10 = pneg %p2987_p4 }
  0x91   : > { %p2995_p1 = pnand %p2994_p2, %p2988_p10 }
  0x93   : > { %2998 = shalt.err (!%p2995_p1)
}
  0x94   : > { %s4031_s15 = smov 8   ;;  %s4032_s1 = smov 128  }
  0x95   : > { %2709 = dma.hbm_to_vmem [thread:$0]  (!%p3390_p6), %s4030_s4, 8192, %s306_s16, [#allocation10], %s4032_s1, %s4032_s1, %s4031_s15  }
  0x96   : > { %s4033_s6 = sld [smem:[#allocation37_spill]] }
  0x9c   : > { %s2999_s29 = scalar_lea.hbm %s4033_s6, 8192 }
  0x9d   : > { %p3000_p13 = scmp.ne.s32.totalorder %s4033_s6, %s2999_s29  ;;  %p3006_p0 = scmp.lt.u32.totalorder %s2999_s29, %s4033_s6 }
  0x9f   : > { %p3002_p1 = pnand %p3000_p13, %p3406_p8 }
  0xa1   : > { %p3003_p2 = pneg %p3002_p1 }
  0xa3   : > { %p3008_p3 = pnand %p3006_p0, %p3003_p2 }
  0xa5   : > { %3011 = shalt.err (!%p3008_p3)
}
  0xa6   : > { %s3012_s16 = scalar_lea.vmem %s3479_s9, 8192  ;;  %p3020_p4 = scmp.lt.s32.totalorder %s3479_s9, %s3479_s9 }
  0xa7   : > { %p3013_p5 = scmp.ne.s32.totalorder %s3479_s9, %s3012_s16  ;;  %p3021_p10 = scmp.lt.s32.totalorder %s3012_s16, %s3012_s16 }
  0xa9   : > { %p3015_p7 = pnand %p3013_p5, %p3406_p8  ;;  %p3022_p11 = por %p3021_p10, %p3020_p4 }
  0xab   : > { %p3016_p9 = pneg %p3015_p7 }
  0xad   : > { %p3023_p12 = pnand %p3022_p11, %p3016_p9 }
  0xaf   : > { %3026 = shalt.err (!%p3023_p12)
}
  0xb0   : > { %s4002_s27 = smov 256   ;;  %s4003_s15 = smov 16  }
  0xb1   : > { %2715 = dma.hbm_to_vmem [thread:$0]  (!%p3390_p6), %s4033_s6, 8192, %s3479_s9, [#allocation13], %s4002_s27, %s4002_s27, %s4003_s15  }
  0xb2   : > { %s3248_s10 = smov [#allocation17]   ;;  %s4034_s8 = sld [smem:[#allocation39_spill]] }
  0xb3   : > { %s357_s24 = sshll.u32 %s3248_s10, 4  ;;  %s358_s24 = int_to_ptr.vmem [resolvable:$true] %s357_s24 }
  0xb8   : > { %s3027_s2 = scalar_lea.hbm %s4034_s8, 16384 }
  0xb9   : > { %p3028_p13 = scmp.ne.s32.totalorder %s4034_s8, %s3027_s2  ;;  %p3034_p0 = scmp.lt.u32.totalorder %s3027_s2, %s4034_s8 }
  0xbb   : > { %p3030_p1 = pnand %p3028_p13, %p3406_p8 }
  0xbd   : > { %p3031_p2 = pneg %p3030_p1 }
  0xbf   : > { %p3036_p3 = pnand %p3034_p0, %p3031_p2 }
  0xc1   : > { %3039 = shalt.err (!%p3036_p3)
}
  0xc2   : > { %s3040_s9 = scalar_lea.vmem %s358_s24, 16384  ;;  %p3048_p4 = scmp.lt.s32.totalorder %s358_s24, %s358_s24 }
  0xc3   : > { %p3041_p5 = scmp.ne.s32.totalorder %s358_s24, %s3040_s9  ;;  %p3049_p10 = scmp.lt.s32.totalorder %s3040_s9, %s3040_s9 }
  0xc5   : > { %p3043_p7 = pnand %p3041_p5, %p3406_p8  ;;  %p3050_p11 = por %p3049_p10, %p3048_p4 }
  0xc7   : > { %p3044_p9 = pneg %p3043_p7 }
  0xc9   : > { %p3051_p12 = pnand %p3050_p11, %p3044_p9 }
  0xcb   : > { %3054 = shalt.err (!%p3051_p12)
}
  0xcc   : > { %2721 = dma.hbm_to_vmem [thread:$0]  (!%p3390_p6), %s4034_s8, 16384, %s358_s24, [#allocation16], %s4002_s27, %s4002_s27, %s4003_s15  }
  0xcd   : > { %s2063_s25 = sadd.s32 4294967294, %s3235_s21   ;;  %s40_s28 = sadd.s32 1, %s3223_s18 }
  0xce   : > { %s43_s10 = sadd.s32 1, %s3227_s19  ;;  %s4035_s26 = sld [smem:[#allocation25_spill]] }
  0xcf   : > { %p41_p8 = scmp.ge.s32.totalorder %s40_s28, 2  ;;  %s47_s29 = sadd.s32 1, %s3231_s20 }
  0xd0   : > { %s4036_s2 = sld [smem:[#allocation24_spill]]  ;;  %s54_s22 = sadd.s32 1, %s3207_s14 }
  0xd1   : > { %s4037_s30 = sld [smem:[#allocation29_spill]]  ;;  %p61_p13 = scmp.ne.s32.totalorder %s3207_s14, %s3203_s13 }
  0xd2   : > { %s4085_s28 = smov (%p41_p8, %s40_s28), 0  ;;  %s4087_s10 = smov (!%p41_p8, %s43_s10), %s3227_s19 }
  0xd3   : > { %p62_p1 = scmp.eq.s32.totalorder %s3235_s21, 0  ;;  %p67_p6 = scmp.ne.s32.totalorder %s3203_s13, %s3199_s12 }
  0xd4   : > { %p45_p2 = scmp.ge.s32.totalorder %s4087_s10, 2  ;;  %s250_s24 = sadd.s32 1, %s3195_s11 }
  0xd5   : > { %p3563_p0 = por %p62_p1, %p61_p13  ;;  %p4039_p3 = scmp.ne.s32.totalorder %s4020_s23, 0 }
  0xd6   : > { %s4089_s10 = smov (%p45_p2, %s4087_s10), 0  ;;  %s4091_s29 = smov (!%p45_p2, %s47_s29), %s3231_s20 }
  0xd7   : > { %p3569_p5 = por %p4039_p3, %p67_p6  ;;  %s246_s12 = ssub.s32 %s3227_s19, %s4089_s10 }
  0xd8   : > { %p260_p7 = scmp.ne.s32.totalorder %s3195_s11, %s4035_s26  ;;  %p49_p9 = scmp.ge.s32.totalorder %s4091_s29, 2 }
  0xd9   : > { %p266_p4 = scmp.ne.s32.totalorder %s4035_s26, %s4036_s2  ;;  %p4041_p10 = scmp.ne.s32.totalorder %s4037_s30, 0 }
  0xda   : > { %p267_p12 = scmp.eq.s32.totalorder %s2063_s25, 7  ;;  %s4093_s29 = smov (%p49_p9, %s4091_s29), 0 }
  0xdb   : > { %p3584_p11 = por %p4041_p10, %p260_p7  ;;  %p2736_p13 = scmp.lt.s32.totalorder %s3235_s21, 8 }
  0xdc   : > { %p3590_p8 = por %p267_p12, %p266_p4  ;;  %s51_s0 = ssub.s32 %s3231_s20, %s4093_s29 }
  0xdd   : > { %s4042_s9 = scalar_select %p3584_p11, 1, 0 }
  0xde   : > { %s4043_s1 = scalar_select %p3590_p8, 1, 0 }
  0xdf   : > { %s371_s27 = sand.u32 1, %s3207_s14   ;;  %p52_p1 = scmp.eq.s32.totalorder %s51_s0, 0 }
  0xe0   : > { %s247_s26 = sor.u32 %s246_s12, %s51_s0  ;;  %s2072_s25 = sshll.u32 %s371_s27, 6 }
  0xe1   : > { %p248_p6 = scmp.eq.s32.totalorder %s247_s26, 0  ;;  %s2106_s15 = sshll.u32 %s3231_s20, 10 }
  0xe2   : > { %s3599_s2 = scalar_select %p52_p1, %s3207_s14, %s54_s22  }
  0xe3   : > { %s3602_s30 = scalar_select %p248_p6, %s3195_s11, %s250_s24  }
  0xe4   : > { %s4044_s5 = sld [smem:[#allocation31_spill]]  ;;  %s375_s7 = scalar_lea.vmem [#allocation6], %s2072_s25 }
  0xe5   : > { %s382_s8 = sshll.u32 %s375_s7, 4  ;;  %p3614_p2 = pnand %p2736_p13, %p3563_p0  ;;  %s3618_s8 = int_to_ptr.vmem [resolvable:$true] %s382_s8 }
  0xe6   : > { %s3620_s24 = scalar_lea.sflag [#allocation7], %s371_s27 }
  0xe7   : > { %p3057_p7 = pneg %p3614_p2 }
  0xea   : > { %s3608_s6 = scalar_lea.hbm %s4044_s5, %s2106_s15  ;;  %s3060_s15 = scalar_lea.hbm %s4044_s5, 2048 }
  0xeb   : > { %s3055_s3 = scalar_lea.hbm %s3608_s6, 1024  ;;  %p3061_p0 = scmp.lt.u32.totalorder %s3608_s6, %s4044_s5 }
  0xec   : > { %p3056_p3 = scmp.ne.s32.totalorder %s3608_s6, %s3055_s3  ;;  %p3062_p10 = scmp.lt.u32.totalorder %s3060_s15, %s3055_s3 }
  0xed   : > { %p3064_p13 = scmp.lt.u32.totalorder %s3055_s3, %s3608_s6 }
  0xee   : > { %p3058_p9 = pnand %p3057_p7, %p3056_p3  ;;  %p3063_p12 = por %p3062_p10, %p3061_p0 }
  0xf0   : > { %p3059_p4 = pneg %p3058_p9  ;;  %p3065_p1 = por %p3064_p13, %p3063_p12 }
  0xf2   : > { %p3066_p6 = pnand %p3065_p1, %p3059_p4 }
  0xf4   : > { %3069 = shalt.err (!%p3066_p6)
}
  0xf5   : > { %s3070_s27 = scalar_lea.vmem %s3618_s8, 1024  ;;  %s3249_s0 = smov [#allocation6]  }
  0xf6   : > { %p3071_p3 = scmp.ne.s32.totalorder %s3618_s8, %s3070_s27  ;;  %s3075_s26 = sshll.u32 %s3249_s0, 4  ;;  %s3076_s26 = int_to_ptr.vmem [resolvable:$false] %s3075_s26 }
  0xf7   : > { %s3077_s25 = scalar_lea.vmem %s3076_s26, 2048  ;;  %p3078_p11 = scmp.lt.s32.totalorder %s3618_s8, %s3076_s26 }
  0xf8   : > { %p3073_p9 = pnand %p3071_p3, %p3057_p7  ;;  %p3079_p0 = scmp.lt.s32.totalorder %s3077_s25, %s3070_s27 }
  0xfa   : > { %p3074_p8 = pneg %p3073_p9  ;;  %p3080_p10 = por %p3079_p0, %p3078_p11 }
  0xfc   : > { %p3081_p12 = pnand %p3080_p10, %p3074_p8 }
  0xfe   : > { %3084 = shalt.err (!%p3081_p12)
}
  0xff   : > { %s4046_s3 = smov 16   ;;  %s4047_s4 = smov 256  }
 0x100   : > { %2725 = dma.hbm_to_vmem [thread:$0]  (!%p3614_p2), %s3608_s6, 1024, %s3618_s8, %s3620_s24, %s4047_s4, %s4047_s4, %s4046_s3  }
 0x101   : > { %s4048_s7 = sld [smem:[#allocation30_spill]] }
 0x107   : > { %p4049_p7 = scmp.ne.s32.totalorder %s4048_s7, 0 }
 0x108   : > { %s396_s15 = sand.u32 (!%p4049_p7), 1, %s3203_s13  }
 0x109   : > { %394 = sbr.rel (%p4049_p7) target bundleno = 2528 (0x9e0), region = 56  ;;  %s2076_s17 = sshll.u32 (!%p4049_p7), %s396_s15, 6 }
 0x10a   : > { %s397_s12 = scalar_lea.sflag (!%p4049_p7), [#allocation7], %s396_s15  ;;  %s3654_s27 = scalar_lea.vmem (!%p4049_p7), [#allocation6], %s2076_s17 }
 0x110   : > { %3166 = dma.done.wait (%p3569_p5), %s397_s12, 1024  }
 0x111   : > { %3168 = vsyncadd (%p3569_p5), %s397_s12, 4294966272  ;;  %p4050_p11 = scmp.ne.s32.totalorder %s4020_s23, 0 }
 0x113   : > { %3170 = dma.done.wait (%p4050_p11), [#allocation10], 16384  }
 0x114   : > { %3172 = vsyncadd (%p4050_p11), [#allocation10], 4294950912 }
 0x115   : > { %3174 = dma.done.wait (%p4050_p11), [#allocation13], 16384  }
 0x116   : > { %3176 = vsyncadd (%p4050_p11), [#allocation13], 4294950912 }
 0x117   : > { %3178 = dma.done.wait (%p4050_p11), [#allocation16], 32768  }
 0x118   : > { %3180 = vsyncadd (%p4050_p11), [#allocation16], 4294934528  ;;  %s4051_s6 = sld [smem:[#allocation25_spill]]  ;;  %s4052_s8 = sld [smem:[#allocation27_spill]] }
 0x119   : > { %s4053_s16 = sld [smem:[#allocation26_spill]] }
 0x11e   : > { %s456_s22 = sand.u32 1, %s4051_s6   ;;  %p460_p5 = scmp.eq.s32.totalorder %s4052_s8, 0 }
 0x11f   : > { %s2083_s24 = sshll.u32 %s456_s22, 5  ;;  %p461_p8 = scmp.eq.s32.totalorder %s4053_s16, 0 }
 0x120   : > { %s3677_s0 = scalar_lea.vmem [#allocation18], %s2083_s24 }
 0x121   : > { %p462_p2 = pnand %p461_p8, %p460_p5 }
 0x122   : > { %v470_v0 = vld [vmem:[%s3654_s27 + $0x20] sm:$0xff] (!%p462_p2)  ;;  %v471_v1 = vld [vmem:[%s3654_s27 + $0x28] sm:$0xff] (!%p462_p2)  ;;  %v472_v7 = vld [vmem:[%s3654_s27 + $0x30] sm:$0xff] (!%p462_p2)  ;;  %v517_v23 = vlaneseq (!%p462_p2)  ;;  %s4054_s25 = sld [smem:[#allocation32_spill]] (!%p462_p2) }
 0x123   : > { %465 = sbr.rel (%p462_p2) target bundleno = 462 (0x1ce), region = 88  ;;  %v466_v2 = vld [vmem:[%s3654_s27] sm:$0xff] (!%p462_p2)  ;;  %v478_v3 = vmul.f32 (!%p462_p2), %v470_v0, %v470_v0  ;;  %v479_v4 = vmul.f32 (!%p462_p2), %v471_v1, %v471_v1  ;;  %v467_v5 = vld [vmem:[%s3654_s27 + $0x8] sm:$0xff] (!%p462_p2)  ;;  %v473_v8 = vld [vmem:[%s3654_s27 + $0x38] sm:$0xff] (!%p462_p2)  ;;  %v480_v10 = vmul.f32 (!%p462_p2), %v472_v7, %v472_v7 }
 0x124   : > { %v474_v6 = vmul.f32 (!%p462_p2), %v466_v2, %v466_v2  ;;  %v475_v9 = vmul.f32 (!%p462_p2), %v467_v5, %v467_v5  ;;  %v481_v11 = vmul.f32 (!%p462_p2), %v473_v8, %v473_v8  ;;  %v468_v12 = vld [vmem:[%s3654_s27 + $0x10] sm:$0xff] (!%p462_p2)  ;;  %v469_v13 = vld [vmem:[%s3654_s27 + $0x18] sm:$0xff] (!%p462_p2)  ;;  %v518_v30 = vshrl.u32 (!%p462_p2), %v517_v23, 7 }
 0x125   : > { %v488_v14 = vadd.f32 (!%p462_p2), %v479_v4, %v478_v3  ;;  %v476_v15 = vmul.f32 (!%p462_p2), %v468_v12, %v468_v12  ;;  %v477_v16 = vmul.f32 (!%p462_p2), %v469_v13, %v469_v13 }
 0x126   : > { %v482_v17 = vadd.f32 (!%p462_p2), %v475_v9, %v474_v6  ;;  %v491_v18 = vadd.f32 (!%p462_p2), %v481_v11, %v480_v10  ;;  %v519_v34 = vsub.s32 (!%p462_p2), 0, %v518_v30  ;;  %v523_v35 = vsub.s32 (!%p462_p2), 1, %v518_v30 }
 0x127   : > { %489 = vadd.xlane.f32.xlu1 (!%p462_p2), %v488_v14  ;;  %v485_v19 = vadd.f32 (!%p462_p2), %v477_v16, %v476_v15 }
 0x128   : > { %483 = vadd.xlane.f32.xlu0 (!%p462_p2), %v482_v17  ;;  %v515_v36 = vld [vmem:[%s4054_s25] sm:$0x3] (!%p462_p2) }
 0x129   : > { %v520_v37 = vrot.slane (!%p462_p2), %v515_v36, %v519_v34  ;;  %v524_v38 = vrot.slane (!%p462_p2), %v515_v36, %v523_v35 }
 0x12b   : > { %492 = vadd.xlane.f32.xlu1 %v491_v18 }
 0x12c   : > { %486 = vadd.xlane.f32.xlu0 %v485_v19 }
 0x1b4   : > { %v490_v20 = vpop.xlane.xlu1 %489 }
 0x1b5   : > { %v497_v21 = vmul.f32 0.00390625, %v490_v20  ;;  %v484_v22 = vpop.xlane.xlu0 %483 }
 0x1b6   : > { %v495_v24 = vmul.f32 0.00390625, %v484_v22 }
 0x1b7   : > { %v501_v25 = vadd.f32 1e-05, %v497_v21 }
 0x1b8   : > { %v499_v26 = vadd.f32 1e-05, %v495_v24  ;;  %v493_v27 = vpop.xlane.xlu1 %492 }
 0x1b9   : > { %2863 = vrsqrt.f32 %v501_v25  ;;  %v498_v28 = vmul.f32 0.00390625, %v493_v27  ;;  %v487_v29 = vpop.xlane.xlu0 %486 }
 0x1ba   : > { %2865 = vrsqrt.f32 %v499_v26  ;;  %v496_v31 = vmul.f32 0.00390625, %v487_v29 }
 0x1bb   : > { %v502_v32 = vadd.f32 1e-05, %v498_v28 }
 0x1bc   : > { %v500_v33 = vadd.f32 1e-05, %v496_v31 }
 0x1bd   : > { %2867 = vrsqrt.f32 %v502_v32 }
 0x1be   : > { %2869 = vrsqrt.f32 %v500_v33 }
 0x1c3   : > { %v2864_v39 = vpop.eup %2863 }
 0x1c4   : > { %v2866_v40 = vpop.eup %2865  ;;  %v511_v41 = vmul.f32 %v2864_v39, %v470_v0  ;;  %v512_v42 = vmul.f32 %v2864_v39, %v471_v1 }
 0x1c5   : > { %v507_v43 = vmul.f32 %v2866_v40, %v466_v2  ;;  %v508_v44 = vmul.f32 %v2866_v40, %v467_v5 }
 0x1c6   : > { %v531_v45 = vmul.f32 %v520_v37, %v511_v41  ;;  %v532_v46 = vmul.f32 %v524_v38, %v512_v42 }
 0x1c7   : > { %v2868_v47 = vpop.eup %2867  ;;  %v527_v48 = vmul.f32 %v520_v37, %v507_v43  ;;  %v528_v49 = vmul.f32 %v524_v38, %v508_v44 }
 0x1c8   : > { %v2870_v50 = vpop.eup %2869  ;;  %539 = vst [vmem:[#allocation2 + $0x20] sm:$0xff] %v531_v45  ;;  %540 = vst [vmem:[#allocation2 + $0x28] sm:$0xff] %v532_v46  ;;  %v513_v51 = vmul.f32 %v2868_v47, %v472_v7  ;;  %v514_v52 = vmul.f32 %v2868_v47, %v473_v8 }
 0x1c9   : > { %535 = vst [vmem:[#allocation2] sm:$0xff] %v527_v48  ;;  %536 = vst [vmem:[#allocation2 + $0x8] sm:$0xff] %v528_v49  ;;  %v509_v53 = vmul.f32 %v2870_v50, %v468_v12  ;;  %v510_v54 = vmul.f32 %v2870_v50, %v469_v13 }
 0x1ca   : > { %v533_v55 = vmul.f32 %v520_v37, %v513_v51  ;;  %v534_v56 = vmul.f32 %v524_v38, %v514_v52 }
 0x1cb   : > { %v529_v57 = vmul.f32 %v520_v37, %v509_v53  ;;  %v530_v58 = vmul.f32 %v524_v38, %v510_v54 }
 0x1cc   : > { %541 = vst [vmem:[#allocation2 + $0x30] sm:$0xff] %v533_v55  ;;  %542 = vst [vmem:[#allocation2 + $0x38] sm:$0xff] %v534_v56 }
 0x1cd   : > { %537 = vst [vmem:[#allocation2 + $0x10] sm:$0xff] %v529_v57  ;;  %538 = vst [vmem:[#allocation2 + $0x18] sm:$0xff] %v530_v58 }
 0x1ce PF: > { %s4055_s3 = sld [smem:[#allocation27_spill]] }
 0x1d4   : > { %p2084_p4 = scmp.ne.s32.totalorder %s4055_s3, 0 }
 0x1d5   : > { %s4056_s4 = sld [smem:[#allocation26_spill]] (!%p2084_p4)  ;;  %v547_v59 = vld [vmem:[#allocation2 + $0x8] sm:$0xff] (!%p2084_p4) }
 0x1d6   : > { %545 = sbr.rel (%p2084_p4) target bundleno = 742 (0x2e6), region = 92  ;;  %652 = vmatprep.mubr.f32.mxu0 (!%p2084_p4), %v547_v59  ;;  %776 = vmatprep.mubr.f32.mxu1 (!%p2084_p4), %v547_v59 }
 0x1db   : > { %s2085_s7 = sshll.u32 (!%p2084_p4), %s4056_s4, 8  ;;  %s2086_s12 = sshll.u32 (!%p2084_p4), %s4056_s4, 5 }
 0x1dc   : > { %s3692_s15 = scalar_lea.vmem (!%p2084_p4), [#allocation11], %s2085_s7  ;;  %s3696_s17 = scalar_lea.vmem (!%p2084_p4), [#allocation12], %s2085_s7 }
 0x1dd   : > { %v572_v60 = vld [vmem:[%s3692_s15 + $0x80] sm:$0xff]  ;;  %v573_v61 = vld [vmem:[%s3692_s15 + $0x88] sm:$0xff]  ;;  %v574_v7 = vld [vmem:[%s3692_s15 + $0x90] sm:$0xff]  ;;  %s674_s6 = scalar_lea.vmem [#allocation3], %s2086_s12  ;;  %s797_s8 = scalar_lea.vmem [#allocation4], %s2086_s12 }
 0x1de   : > { %v696_v62 = vld [vmem:[%s3696_s17 + $0x80] sm:$0xff]  ;;  %v2271_v63 = vpack.c.bf16 %v573_v61, %v572_v60  ;;  %v697_v0 = vld [vmem:[%s3696_s17 + $0x88] sm:$0xff]  ;;  %v575_v9 = vld [vmem:[%s3692_s15 + $0x98] sm:$0xff] }
 0x1df   : > { %v556_v1 = vld [vmem:[%s3692_s15] sm:$0xff]  ;;  %v557_v2 = vld [vmem:[%s3692_s15 + $0x8] sm:$0xff]  ;;  %v2303_v3 = vpack.c.bf16 %v697_v0, %v696_v62  ;;  %v698_v10 = vld [vmem:[%s3696_s17 + $0x90] sm:$0xff]  ;;  %v2275_v12 = vpack.c.bf16 %v575_v9, %v574_v7 }
 0x1e0   : > { %v2273_v4 = vpack.c.bf16 %v557_v2, %v556_v1  ;;  %v680_v5 = vld [vmem:[%s3696_s17] sm:$0xff]  ;;  %v681_v6 = vld [vmem:[%s3696_s17 + $0x8] sm:$0xff]  ;;  %2272 = vmatprep.subr.bf16.mxu0 %v2271_v63  ;;  %v699_v11 = vld [vmem:[%s3696_s17 + $0x98] sm:$0xff] }
 0x1e1   : > { %v2305_v8 = vpack.c.bf16 %v681_v6, %v680_v5  ;;  %2304 = vmatprep.subr.bf16.mxu1 %v2303_v3  ;;  %v2307_v13 = vpack.c.bf16 %v699_v11, %v698_v10  ;;  %v558_v14 = vld [vmem:[%s3692_s15 + $0x10] sm:$0xff]  ;;  %v559_v15 = vld [vmem:[%s3692_s15 + $0x18] sm:$0xff]  ;;  %v576_v19 = vld [vmem:[%s3692_s15 + $0xa0] sm:$0xff] }
 0x1e2   : > { %2274 = vmatpush3.bf16.msra.mxu0 %v2273_v4  ;;  %v682_v16 = vld [vmem:[%s3696_s17 + $0x10] sm:$0xff]  ;;  %v2277_v17 = vpack.c.bf16 %v559_v15, %v558_v14  ;;  %v683_v18 = vld [vmem:[%s3696_s17 + $0x18] sm:$0xff]  ;;  %v577_v20 = vld [vmem:[%s3692_s15 + $0xa8] sm:$0xff] }
 0x1e3   : > { %2306 = vmatpush3.bf16.msra.mxu1 %v2305_v8  ;;  %2276 = vmatprep.subr.bf16.mxu0 %v2275_v12  ;;  %v2309_v21 = vpack.c.bf16 %v683_v18, %v682_v16  ;;  %v2279_v22 = vpack.c.bf16 %v577_v20, %v576_v19  ;;  %v700_v23 = vld [vmem:[%s3696_s17 + $0xa0] sm:$0xff]  ;;  %v701_v24 = vld [vmem:[%s3696_s17 + $0xa8] sm:$0xff]  ;;  %v578_v31 = vld [vmem:[%s3692_s15 + $0xb0] sm:$0xff] }
 0x1e4   : > { %2308 = vmatprep.subr.bf16.mxu1 %v2307_v13  ;;  %v560_v25 = vld [vmem:[%s3692_s15 + $0x20] sm:$0xff]  ;;  %v2311_v26 = vpack.c.bf16 %v701_v24, %v700_v23  ;;  %v561_v27 = vld [vmem:[%s3692_s15 + $0x28] sm:$0xff]  ;;  %v579_v32 = vld [vmem:[%s3692_s15 + $0xb8] sm:$0xff] }
 0x1e5   : > { %v684_v28 = vld [vmem:[%s3696_s17 + $0x20] sm:$0xff]  ;;  %v685_v29 = vld [vmem:[%s3696_s17 + $0x28] sm:$0xff]  ;;  %v2281_v30 = vpack.c.bf16 %v561_v27, %v560_v25  ;;  %v702_v33 = vld [vmem:[%s3696_s17 + $0xb0] sm:$0xff]  ;;  %v2283_v35 = vpack.c.bf16 %v579_v32, %v578_v31 }
 0x1e6   : > { %2278 = vmatpush3.bf16.msra.mxu0 %v2277_v17  ;;  %v2313_v34 = vpack.c.bf16 %v685_v29, %v684_v28  ;;  %v703_v36 = vld [vmem:[%s3696_s17 + $0xb8] sm:$0xff]  ;;  %v562_v37 = vld [vmem:[%s3692_s15 + $0x30] sm:$0xff]  ;;  %v580_v42 = vld [vmem:[%s3692_s15 + $0xc0] sm:$0xff] }
 0x1e7   : > { %2310 = vmatpush3.bf16.msra.mxu1 %v2309_v21  ;;  %2280 = vmatprep.subr.bf16.mxu0 %v2279_v22  ;;  %v563_v38 = vld [vmem:[%s3692_s15 + $0x38] sm:$0xff]  ;;  %v2315_v39 = vpack.c.bf16 %v703_v36, %v702_v33  ;;  %v686_v40 = vld [vmem:[%s3696_s17 + $0x30] sm:$0xff]  ;;  %v581_v43 = vld [vmem:[%s3692_s15 + $0xc8] sm:$0xff] }
 0x1e8   : > { %2312 = vmatprep.subr.bf16.mxu1 %v2311_v26  ;;  %v687_v41 = vld [vmem:[%s3696_s17 + $0x38] sm:$0xff]  ;;  %v704_v44 = vld [vmem:[%s3696_s17 + $0xc0] sm:$0xff]  ;;  %v705_v45 = vld [vmem:[%s3696_s17 + $0xc8] sm:$0xff]  ;;  %v2285_v46 = vpack.c.bf16 %v563_v38, %v562_v37  ;;  %v2287_v48 = vpack.c.bf16 %v581_v43, %v580_v42 }
 0x1e9   : > { %v2317_v47 = vpack.c.bf16 %v687_v41, %v686_v40  ;;  %v564_v49 = vld [vmem:[%s3692_s15 + $0x40] sm:$0xff]  ;;  %v565_v50 = vld [vmem:[%s3692_s15 + $0x48] sm:$0xff]  ;;  %v2319_v52 = vpack.c.bf16 %v705_v45, %v704_v44  ;;  %v582_v54 = vld [vmem:[%s3692_s15 + $0xd0] sm:$0xff] }
 0x1ea   : > { %2282 = vmatpush3.bf16.msra.mxu0 %v2281_v30  ;;  %v688_v51 = vld [vmem:[%s3696_s17 + $0x40] sm:$0xff]  ;;  %v689_v53 = vld [vmem:[%s3696_s17 + $0x48] sm:$0xff]  ;;  %v583_v55 = vld [vmem:[%s3692_s15 + $0xd8] sm:$0xff]  ;;  %v2289_v58 = vpack.c.bf16 %v565_v50, %v564_v49 }
 0x1eb   : > { %2314 = vmatpush3.bf16.msra.mxu1 %v2313_v34  ;;  %2284 = vmatprep.subr.bf16.mxu0 %v2283_v35  ;;  %v706_v56 = vld [vmem:[%s3696_s17 + $0xd0] sm:$0xff]  ;;  %v707_v57 = vld [vmem:[%s3696_s17 + $0xd8] sm:$0xff]  ;;  %v2321_v59 = vpack.c.bf16 %v689_v53, %v688_v51  ;;  %v2291_v60 = vpack.c.bf16 %v583_v55, %v582_v54  ;;  %v584_v2 = vld [vmem:[%s3692_s15 + $0xe0] sm:$0xff] }
 0x1ec   : > { %2316 = vmatprep.subr.bf16.mxu1 %v2315_v39  ;;  %v566_v61 = vld [vmem:[%s3692_s15 + $0x50] sm:$0xff]  ;;  %v567_v62 = vld [vmem:[%s3692_s15 + $0x58] sm:$0xff]  ;;  %v2323_v0 = vpack.c.bf16 %v707_v57, %v706_v56  ;;  %v585_v3 = vld [vmem:[%s3692_s15 + $0xe8] sm:$0xff] }
 0x1ed   : > { %v690_v63 = vld [vmem:[%s3696_s17 + $0x50] sm:$0xff]  ;;  %v691_v1 = vld [vmem:[%s3696_s17 + $0x58] sm:$0xff]  ;;  %v708_v4 = vld [vmem:[%s3696_s17 + $0xe0] sm:$0xff]  ;;  %v2293_v6 = vpack.c.bf16 %v567_v62, %v566_v61  ;;  %v2295_v8 = vpack.c.bf16 %v585_v3, %v584_v2 }
 0x1ee   : > { %2286 = vmatpush3.bf16.msra.mxu0 %v2285_v46  ;;  %v709_v5 = vld [vmem:[%s3696_s17 + $0xe8] sm:$0xff]  ;;  %v2325_v7 = vpack.c.bf16 %v691_v1, %v690_v63  ;;  %v568_v9 = vld [vmem:[%s3692_s15 + $0x60] sm:$0xff]  ;;  %v586_v14 = vld [vmem:[%s3692_s15 + $0xf0] sm:$0xff] }
 0x1ef   : > { %2318 = vmatpush3.bf16.msra.mxu1 %v2317_v47  ;;  %2288 = vmatprep.subr.bf16.mxu0 %v2287_v48  ;;  %v569_v10 = vld [vmem:[%s3692_s15 + $0x68] sm:$0xff]  ;;  %v692_v11 = vld [vmem:[%s3696_s17 + $0x60] sm:$0xff]  ;;  %v2327_v12 = vpack.c.bf16 %v709_v5, %v708_v4  ;;  %v587_v15 = vld [vmem:[%s3692_s15 + $0xf8] sm:$0xff] }
 0x1f0   : > { %2320 = vmatprep.subr.bf16.mxu1 %v2319_v52  ;;  %v693_v13 = vld [vmem:[%s3696_s17 + $0x68] sm:$0xff]  ;;  %v710_v16 = vld [vmem:[%s3696_s17 + $0xf0] sm:$0xff]  ;;  %v711_v17 = vld [vmem:[%s3696_s17 + $0xf8] sm:$0xff]  ;;  %v2297_v18 = vpack.c.bf16 %v569_v10, %v568_v9  ;;  %v2299_v20 = vpack.c.bf16 %v587_v15, %v586_v14 }
 0x1f1   : > { %v2329_v19 = vpack.c.bf16 %v693_v13, %v692_v11  ;;  %v570_v21 = vld [vmem:[%s3692_s15 + $0x70] sm:$0xff]  ;;  %v571_v22 = vld [vmem:[%s3692_s15 + $0x78] sm:$0xff]  ;;  %v2331_v23 = vpack.c.bf16 %v711_v17, %v710_v16  ;;  %v546_v28 = vld [vmem:[#allocation2] sm:$0xff] }
 0x1f2   : > { %2290 = vmatpush3.bf16.msra.mxu0 %v2289_v58  ;;  %v694_v24 = vld [vmem:[%s3696_s17 + $0x70] sm:$0xff]  ;;  %v695_v25 = vld [vmem:[%s3696_s17 + $0x78] sm:$0xff]  ;;  %v2301_v26 = vpack.c.bf16 %v571_v22, %v570_v21  ;;  %v551_v31 = vld [vmem:[#allocation2 + $0x28] sm:$0xff] }
 0x1f3   : > { %2322 = vmatpush3.bf16.msra.mxu1 %v2321_v59  ;;  %2292 = vmatprep.subr.bf16.mxu0 %v2291_v60  ;;  %v2333_v27 = vpack.c.bf16 %v695_v25, %v694_v24  ;;  %v549_v29 = vld [vmem:[#allocation2 + $0x18] sm:$0xff]  ;;  %v548_v30 = vld [vmem:[#allocation2 + $0x10] sm:$0xff]  ;;  %v550_v32 = vld [vmem:[#allocation2 + $0x20] sm:$0xff] }
 0x1f4   : > { %2324 = vmatprep.subr.bf16.mxu1 %v2323_v0  ;;  %v553_v33 = vld [vmem:[#allocation2 + $0x38] sm:$0xff]  ;;  %v552_v34 = vld [vmem:[#allocation2 + $0x30] sm:$0xff] }
 0x1f6   : > { %2294 = vmatpush3.bf16.msra.mxu0 %v2293_v6 }
 0x1f7   : > { %2326 = vmatpush3.bf16.msra.mxu1 %v2325_v7  ;;  %2296 = vmatprep.subr.bf16.mxu0 %v2295_v8 }
 0x1f8   : > { %2328 = vmatprep.subr.bf16.mxu1 %v2327_v12 }
 0x1fa   : > { %2298 = vmatpush3.bf16.msra.mxu0 %v2297_v18 }
 0x1fb   : > { %2330 = vmatpush3.bf16.msra.mxu1 %v2329_v19  ;;  %2300 = vmatprep.subr.bf16.mxu0 %v2299_v20 }
 0x1fc   : > { %2332 = vmatprep.subr.bf16.mxu1 %v2331_v23 }
 0x1fe   : > { %2302 = vmatpush3.bf16.msra.mxu0 %v2301_v26 }
 0x1ff   : > { %2334 = vmatpush3.bf16.msra.mxu1 %v2333_v27 }
 0x201   : > { %653 = vmatmul.mubr.f32.vlgmr.msra.gmra.mrb[0].mxu0 %v546_v28 }
 0x202   : > { %777 = vmatmul.mubr.f32.vlgmr.msra.gmra.mrb[0].mxu1 %v546_v28  ;;  %657 = vmatprep.mubr.f32.mxu0 %v549_v29 }
 0x203   : > { %781 = vmatprep.mubr.f32.mxu1 %v549_v29 }
 0x205   : > { %658 = vmatmul.mubr.f32.gmra.mrb[2].mxu0 %v548_v30 }
 0x206   : > { %782 = vmatmul.mubr.f32.gmra.mrb[2].mxu1 %v548_v30  ;;  %662 = vmatprep.mubr.f32.mxu0 %v551_v31 }
 0x207   : > { %786 = vmatprep.mubr.f32.mxu1 %v551_v31 }
 0x209   : > { %663 = vmatmul.mubr.f32.gmra.mrb[4].mxu0 %v550_v32 }
 0x20a   : > { %787 = vmatmul.mubr.f32.gmra.mrb[4].mxu1 %v550_v32  ;;  %667 = vmatprep.mubr.f32.mxu0 %v553_v33 }
 0x20b   : > { %791 = vmatprep.mubr.f32.mxu1 %v553_v33 }
 0x20d   : > { %668 = vmatmul.mubr.f32.gmra.mrb[6].mxu0 %v552_v34 }
 0x20e   : > { %792 = vmatmul.mubr.f32.gmra.mrb[6].mxu1 %v552_v34 }
 0x2d4   : > { %v2143_v35 = vpop.f32.mrb[0].mxu0 }
 0x2d5   : > { %v2187_v36 = vpop.f32.mrb[0].mxu1  ;;  %v2144_v37 = vpop.f32.mrb[1].mxu0 }
 0x2d6   : > { %v2145_v38 = vadd.f32 %v2144_v37, %v2143_v35  ;;  %v2188_v39 = vpop.f32.mrb[1].mxu1 }
 0x2d7   : > { %v2189_v40 = vadd.f32 %v2188_v39, %v2187_v36 }
 0x2d8   : > { %675 = vst [vmem:[%s674_s6] sm:$0xff] %v2145_v38  ;;  %v2146_v41 = vpop.f32.mrb[2].mxu0 }
 0x2d9   : > { %798 = vst [vmem:[%s797_s8] sm:$0xff] %v2189_v40  ;;  %v2190_v42 = vpop.f32.mrb[2].mxu1  ;;  %v2147_v43 = vpop.f32.mrb[3].mxu0 }
 0x2da   : > { %v2148_v44 = vadd.f32 %v2147_v43, %v2146_v41  ;;  %v2191_v45 = vpop.f32.mrb[3].mxu1 }
 0x2db   : > { %v2192_v46 = vadd.f32 %v2191_v45, %v2190_v42 }
 0x2dc   : > { %676 = vst [vmem:[%s674_s6 + $0x8] sm:$0xff] %v2148_v44  ;;  %v2149_v47 = vpop.f32.mrb[4].mxu0 }
 0x2dd   : > { %799 = vst [vmem:[%s797_s8 + $0x8] sm:$0xff] %v2192_v46  ;;  %v2193_v48 = vpop.f32.mrb[4].mxu1  ;;  %v2150_v49 = vpop.f32.mrb[5].mxu0 }
 0x2de   : > { %v2151_v50 = vadd.f32 %v2150_v49, %v2149_v47  ;;  %v2194_v51 = vpop.f32.mrb[5].mxu1 }
 0x2df   : > { %v2195_v52 = vadd.f32 %v2194_v51, %v2193_v48 }
 0x2e0   : > { %677 = vst [vmem:[%s674_s6 + $0x10] sm:$0xff] %v2151_v50  ;;  %v2152_v53 = vpop.f32.mrb[6].mxu0 }
 0x2e1   : > { %800 = vst [vmem:[%s797_s8 + $0x10] sm:$0xff] %v2195_v52  ;;  %v2196_v54 = vpop.f32.mrb[6].mxu1  ;;  %v2153_v55 = vpop.f32.mrb[7].mxu0 }
 0x2e2   : > { %v2154_v56 = vadd.f32 %v2153_v55, %v2152_v53  ;;  %v2197_v57 = vpop.f32.mrb[7].mxu1 }
 0x2e3   : > { %v2198_v58 = vadd.f32 %v2197_v57, %v2196_v54 }
 0x2e4   : > { %678 = vst [vmem:[%s674_s6 + $0x18] sm:$0xff] %v2154_v56 }
 0x2e5   : > { %801 = vst [vmem:[%s797_s8 + $0x18] sm:$0xff] %v2198_v58 }
 0x2e6 PF: > { %s4057_s16 = sld [smem:[#allocation27_spill]]  ;;  %s4058_s23 = sld [smem:[#allocation26_spill]] }
 0x2ec   : > { %s2087_s24 = sshll.u32 %s4057_s16, 4  ;;  %p2088_p13 = scmp.ne.s32.totalorder %s4058_s23, 0 }
 0x2ed   : > { %s806_s26 = sshra.s32 (!%p2088_p13), %s2087_s24, 3 }
 0x2ee   : > { %805 = sbr.rel (%p2088_p13) target bundleno = 757 (0x2f5), region = 96  ;;  %s2107_s25 = sshll.u32 (!%p2088_p13), %s806_s26, 4 }
 0x2ef   : > { %s810_s3 = scalar_lea.vmem (!%p2088_p13), %s3654_s27, %s2107_s25 [#allocation6] }
 0x2f0   : > { %v811_v59 = vld [vmem:[%s810_s3] sm:$0xff] (!%p2088_p13)  ;;  %v812_v60 = vld [vmem:[%s810_s3 + $0x8] sm:$0xff] (!%p2088_p13)  ;;  %v813_v61 = vld [vmem:[%s810_s3 + $0x10] sm:$0xff] (!%p2088_p13) }
 0x2f1   : > { %815 = vst [vmem:[#allocation5] sm:$0xff] (!%p2088_p13), %v811_v59  ;;  %816 = vst [vmem:[#allocation5 + $0x8] sm:$0xff] (!%p2088_p13), %v812_v60  ;;  %v814_v62 = vld [vmem:[%s810_s3 + $0x18] sm:$0xff] (!%p2088_p13) }
 0x2f2   : > { %817 = vst [vmem:[#allocation5 + $0x10] sm:$0xff] (!%p2088_p13), %v813_v61  ;;  %818 = vst [vmem:[#allocation5 + $0x18] sm:$0xff] (!%p2088_p13), %v814_v62 }
 0x2f5 PF: > { %s4059_s4 = sld [smem:[#allocation26_spill]]  ;;  %s819_s27 = sshra.s32 %s2087_s24, 3  ;;  %vm1023_vm0 = vcmask 261120  }
 0x2f6   : > { %s2108_s17 = sshll.u32 %s819_s27, 4 }
 0x2f7   : > { %s3787_s12 = scalar_lea.vmem [#allocation2], %s2108_s17 }
 0x2f8   : > { %v825_v24 = vld [vmem:[%s3787_s12 + $0x8] sm:$0xff]  ;;  %v824_v51 = vld [vmem:[%s3787_s12] sm:$0xff]  ;;  %v827_v52 = vld [vmem:[%s3787_s12 + $0x18] sm:$0xff] }
 0x2f9   : > { %926 = vmatprep.mubr.f32.mxu0 %v825_v24  ;;  %v826_v53 = vld [vmem:[%s3787_s12 + $0x10] sm:$0xff] }
 0x2fb   : > { %s2093_s7 = sshll.u32 %s4059_s4, 8  ;;  %s2094_s6 = sshll.u32 %s4059_s4, 5 }
 0x2fc   : > { %s3767_s15 = scalar_lea.vmem [#allocation9], %s2093_s7  ;;  %s938_s8 = scalar_lea.vmem [#allocation3], %s2094_s6 }
 0x2fd   : > { %v846_v63 = vld [vmem:[%s3767_s15 + $0x80] sm:$0xff]  ;;  %v847_v0 = vld [vmem:[%s3767_s15 + $0x88] sm:$0xff]  ;;  %v848_v4 = vld [vmem:[%s3767_s15 + $0x90] sm:$0xff]  ;;  %s943_s16 = scalar_lea.vmem [#allocation4], %s2094_s6  ;;  %s3820_s24 = scalar_lea.vmem [#allocation14], %s2093_s7 }
 0x2fe   : > { %v830_v1 = vld [vmem:[%s3767_s15] sm:$0xff]  ;;  %v2335_v2 = vpack.c.bf16 %v847_v0, %v846_v63  ;;  %v831_v3 = vld [vmem:[%s3767_s15 + $0x8] sm:$0xff]  ;;  %v849_v5 = vld [vmem:[%s3767_s15 + $0x98] sm:$0xff]  ;;  %p2098_p1 = scmp.ne.s32.totalorder %s4059_s4, 1 }
 0x2ff   : > { %v2337_v6 = vpack.c.bf16 %v831_v3, %v830_v1  ;;  %v2339_v7 = vpack.c.bf16 %v849_v5, %v848_v4  ;;  %v832_v8 = vld [vmem:[%s3767_s15 + $0x10] sm:$0xff]  ;;  %v833_v9 = vld [vmem:[%s3767_s15 + $0x18] sm:$0xff]  ;;  %v850_v10 = vld [vmem:[%s3767_s15 + $0xa0] sm:$0xff]  ;;  %s4060_s25 = sld [smem:[#allocation33_spill]] (!%p2098_p1) }
 0x300   : > { %2336 = vmatprep.subr.bf16.mxu0 %v2335_v2  ;;  %v851_v11 = vld [vmem:[%s3767_s15 + $0xa8] sm:$0xff]  ;;  %v2341_v12 = vpack.c.bf16 %v833_v9, %v832_v8  ;;  %v834_v14 = vld [vmem:[%s3767_s15 + $0x20] sm:$0xff]  ;;  %v852_v16 = vld [vmem:[%s3767_s15 + $0xb0] sm:$0xff] }
 0x301   : > { %2338 = vmatpush3.bf16.msra.mxu0 %v2337_v6  ;;  %v2343_v13 = vpack.c.bf16 %v851_v11, %v850_v10  ;;  %v835_v15 = vld [vmem:[%s3767_s15 + $0x28] sm:$0xff]  ;;  %v853_v17 = vld [vmem:[%s3767_s15 + $0xb8] sm:$0xff]  ;;  %v836_v20 = vld [vmem:[%s3767_s15 + $0x30] sm:$0xff] }
 0x302   : > { %2340 = vmatprep.subr.bf16.mxu0 %v2339_v7  ;;  %v2345_v18 = vpack.c.bf16 %v835_v15, %v834_v14  ;;  %v2347_v19 = vpack.c.bf16 %v853_v17, %v852_v16  ;;  %v837_v21 = vld [vmem:[%s3767_s15 + $0x38] sm:$0xff]  ;;  %v854_v22 = vld [vmem:[%s3767_s15 + $0xc0] sm:$0xff]  ;;  %v855_v23 = vld [vmem:[%s3767_s15 + $0xc8] sm:$0xff] }
 0x303   : > { %v2349_v25 = vpack.c.bf16 %v837_v21, %v836_v20  ;;  %v2351_v26 = vpack.c.bf16 %v855_v23, %v854_v22  ;;  %v838_v27 = vld [vmem:[%s3767_s15 + $0x40] sm:$0xff]  ;;  %v839_v28 = vld [vmem:[%s3767_s15 + $0x48] sm:$0xff]  ;;  %v856_v29 = vld [vmem:[%s3767_s15 + $0xd0] sm:$0xff] }
 0x304   : > { %v857_v30 = vld [vmem:[%s3767_s15 + $0xd8] sm:$0xff]  ;;  %v2353_v31 = vpack.c.bf16 %v839_v28, %v838_v27  ;;  %v840_v33 = vld [vmem:[%s3767_s15 + $0x50] sm:$0xff]  ;;  %v858_v35 = vld [vmem:[%s3767_s15 + $0xe0] sm:$0xff] }
 0x305   : > { %2342 = vmatpush3.bf16.msra.mxu0 %v2341_v12  ;;  %v2355_v32 = vpack.c.bf16 %v857_v30, %v856_v29  ;;  %v841_v34 = vld [vmem:[%s3767_s15 + $0x58] sm:$0xff]  ;;  %v859_v36 = vld [vmem:[%s3767_s15 + $0xe8] sm:$0xff]  ;;  %v842_v39 = vld [vmem:[%s3767_s15 + $0x60] sm:$0xff] }
 0x306   : > { %2344 = vmatprep.subr.bf16.mxu0 %v2343_v13  ;;  %v2357_v37 = vpack.c.bf16 %v841_v34, %v840_v33  ;;  %v2359_v38 = vpack.c.bf16 %v859_v36, %v858_v35  ;;  %v843_v40 = vld [vmem:[%s3767_s15 + $0x68] sm:$0xff]  ;;  %v860_v41 = vld [vmem:[%s3767_s15 + $0xf0] sm:$0xff]  ;;  %v861_v42 = vld [vmem:[%s3767_s15 + $0xf8] sm:$0xff] }
 0x307   : > { %v2361_v43 = vpack.c.bf16 %v843_v40, %v842_v39  ;;  %v2363_v44 = vpack.c.bf16 %v861_v42, %v860_v41  ;;  %v844_v45 = vld [vmem:[%s3767_s15 + $0x70] sm:$0xff]  ;;  %v845_v46 = vld [vmem:[%s3767_s15 + $0x78] sm:$0xff]  ;;  %v939_v47 = vld [vmem:[%s938_s8] sm:$0xff] }
 0x308   : > { %v940_v48 = vld [vmem:[%s938_s8 + $0x8] sm:$0xff]  ;;  %v2365_v49 = vpack.c.bf16 %v845_v46, %v844_v45  ;;  %v941_v54 = vld [vmem:[%s938_s8 + $0x10] sm:$0xff]  ;;  %v942_v55 = vld [vmem:[%s938_s8 + $0x18] sm:$0xff] }
 0x309   : > { %2346 = vmatpush3.bf16.msra.mxu0 %v2345_v18  ;;  %v2367_v50 = vpack.c.bf16 %v940_v48, %v939_v47  ;;  %v2371_v56 = vpack.c.bf16 %v942_v55, %v941_v54  ;;  %v944_v3 = vld [vmem:[%s943_s16] sm:$0xff]  ;;  %v945_v4 = vld [vmem:[%s943_s16 + $0x8] sm:$0xff]  ;;  %v946_v5 = vld [vmem:[%s943_s16 + $0x10] sm:$0xff] }
 0x30a   : > { %2348 = vmatprep.subr.bf16.mxu0 %v2347_v19  ;;  %v2375_v6 = vpack.c.bf16 %v945_v4, %v944_v3  ;;  %v947_v7 = vld [vmem:[%s943_s16 + $0x18] sm:$0xff]  ;;  %v1134_v19 = vld [vmem:[%s3820_s24 + $0x8] sm:$0xff]  ;;  %v1133_v21 = vld [vmem:[%s3820_s24] sm:$0xff]  ;;  %v3250_v3 = vmov 0.0  }
 0x30b   : > { %v2379_v8 = vpack.c.bf16 %v947_v7, %v946_v5  ;;  %v1136_v20 = vld [vmem:[%s3820_s24 + $0x18] sm:$0xff]  ;;  %v1135_v23 = vld [vmem:[%s3820_s24 + $0x10] sm:$0xff]  ;;  %v1138_v24 = vld [vmem:[%s3820_s24 + $0x28] sm:$0xff] }
 0x30c   : > { %2376 = vmatprep.subr.bf16.mxu1 %v2375_v6  ;;  %v2383_v22 = vpack.c.bf16 %v1136_v20, %v1134_v19  ;;  %v1137_v28 = vld [vmem:[%s3820_s24 + $0x20] sm:$0xff]  ;;  %v1139_v29 = vld [vmem:[%s3820_s24 + $0x30] sm:$0xff]  ;;  %v1142_v30 = vld [vmem:[%s3820_s24 + $0x48] sm:$0xff] }
 0x30d   : > { %2350 = vmatpush3.bf16.msra.mxu0 %v2349_v25  ;;  %2378 = vmatpush3.bf16.msra.mxu1 %v2375_v6  ;;  %v1140_v25 = vld [vmem:[%s3820_s24 + $0x38] sm:$0xff]  ;;  %v1141_v34 = vld [vmem:[%s3820_s24 + $0x40] sm:$0xff]  ;;  %v1143_v35 = vld [vmem:[%s3820_s24 + $0x50] sm:$0xff] }
 0x30e   : > { %2352 = vmatprep.subr.bf16.mxu0 %v2351_v26  ;;  %2380 = vmatprep.subr.bf16.mxu1 %v2379_v8  ;;  %v2385_v26 = vpack.c.bf16 %v1135_v23, %v1133_v21  ;;  %v2387_v27 = vpack.c.bf16 %v1140_v25, %v1138_v24  ;;  %v1146_v36 = vld [vmem:[%s3820_s24 + $0x68] sm:$0xff]  ;;  %v1145_v40 = vld [vmem:[%s3820_s24 + $0x60] sm:$0xff]  ;;  %v1147_v41 = vld [vmem:[%s3820_s24 + $0x70] sm:$0xff] }
 0x30f   : > { %v1150_v42 = vld [vmem:[%s3820_s24 + $0x88] sm:$0xff]  ;;  %v1149_v46 = vld [vmem:[%s3820_s24 + $0x80] sm:$0xff]  ;;  %v1151_v47 = vld [vmem:[%s3820_s24 + $0x90] sm:$0xff] }
 0x310   : > { %v1154_v48 = vld [vmem:[%s3820_s24 + $0xa8] sm:$0xff]  ;;  %v1160_v55 = vld [vmem:[%s3820_s24 + $0xd8] sm:$0xff] }
 0x311   : > { %2354 = vmatpush3.bf16.msra.mxu0 %v2353_v31  ;;  %2382 = vmatpush3.bf16.msra.mxu1 %v2379_v8  ;;  %v1144_v31 = vld [vmem:[%s3820_s24 + $0x58] sm:$0xff]  ;;  %v1158_v54 = vld [vmem:[%s3820_s24 + $0xc8] sm:$0xff] }
 0x312   : > { %2356 = vmatprep.subr.bf16.mxu0 %v2355_v32  ;;  %2384 = vmatprep.subr.bf16.mxu1 %v2383_v22  ;;  %v2389_v32 = vpack.c.bf16 %v1139_v29, %v1137_v28  ;;  %v2391_v33 = vpack.c.bf16 %v1144_v31, %v1142_v30  ;;  %v1130_v19 = vld [vmem:[#allocation5 + $0x18] sm:$0xff]  ;;  %v1296_v31 = vld [vmem:[#allocation15 + $0x8] sm:$0xff] (!%p2098_p1) }
 0x315   : > { %2358 = vmatpush3.bf16.msra.mxu0 %v2357_v37  ;;  %v1148_v37 = vld [vmem:[%s3820_s24 + $0x78] sm:$0xff] }
 0x316   : > { %2360 = vmatprep.subr.bf16.mxu0 %v2359_v38  ;;  %v2393_v38 = vpack.c.bf16 %v1143_v35, %v1141_v34  ;;  %v2395_v39 = vpack.c.bf16 %v1148_v37, %v1146_v36  ;;  %v1295_v35 = vld [vmem:[#allocation15] sm:$0xff] (!%p2098_p1)  ;;  %v1304_v37 = vld [vmem:[#allocation15 + $0x48] sm:$0xff] (!%p2098_p1) }
 0x317   : > { %v1299_v36 = vld [vmem:[#allocation15 + $0x20] sm:$0xff] (!%p2098_p1) }
 0x319   : > { %2362 = vmatpush3.bf16.msra.mxu0 %v2361_v43  ;;  %v1152_v43 = vld [vmem:[%s3820_s24 + $0x98] sm:$0xff] }
 0x31a   : > { %2364 = vmatprep.subr.bf16.mxu0 %v2363_v44  ;;  %v2397_v44 = vpack.c.bf16 %v1147_v41, %v1145_v40  ;;  %v2399_v45 = vpack.c.bf16 %v1152_v43, %v1150_v42  ;;  %v1308_v40 = vld [vmem:[#allocation15 + $0x68] sm:$0xff] (!%p2098_p1)  ;;  %v1303_v41 = vld [vmem:[#allocation15 + $0x40] sm:$0xff] (!%p2098_p1) }
 0x31b   : > { %v1307_v42 = vld [vmem:[#allocation15 + $0x60] sm:$0xff] (!%p2098_p1)  ;;  %v2419_v43 = vpack.c.bf16 (!%p2098_p1), %v1308_v40, %v1304_v37  ;;  %v1388_v40 = vld [vmem:[#allocation15 + $0x2e8] sm:$0xff] (!%p2098_p1) }
 0x31c   : > { %v1375_v37 = vld [vmem:[#allocation15 + $0x280] sm:$0xff] (!%p2098_p1) }
 0x31d   : > { %2366 = vmatpush3.bf16.msra.mxu0 %v2365_v49  ;;  %v1156_v49 = vld [vmem:[%s3820_s24 + $0xb8] sm:$0xff] }
 0x31e   : > { %2368 = vmatprep.subr.bf16.mxu0 %v2367_v50 }
 0x320   : > { %927 = vmatmul.mubr.f32.vlgmr.msra.gmra.mrb[0].mxu0 %v824_v51  ;;  %v2403_v51 = vpack.c.bf16 %v1156_v49, %v1154_v48  ;;  %v1311_v49 = vld [vmem:[#allocation15 + $0x80] sm:$0xff] (!%p2098_p1) }
 0x321   : > { %931 = vmatprep.mubr.f32.mxu0 %v827_v52  ;;  %v1153_v52 = vld [vmem:[%s3820_s24 + $0xa0] sm:$0xff] }
 0x324   : > { %932 = vmatmul.mubr.f32.gmra.mrb[2].mxu0 %v826_v53  ;;  %v1155_v53 = vld [vmem:[%s3820_s24 + $0xb0] sm:$0xff] }
 0x326   : > { %2370 = vmatpush3.bf16.xpose.msra.mxu0 %v2367_v50  ;;  %v2401_v50 = vpack.c.bf16 %v1151_v47, %v1149_v46  ;;  %v2421_v47 = vpack.c.bf16 (!%p2098_p1), %v1307_v42, %v1303_v41 }
 0x327   : > { %2372 = vmatprep.subr.bf16.mxu0 %v2371_v56 }
 0x32e   : > { %2374 = vmatpush3.bf16.xpose.msra.mxu0 %v2371_v56  ;;  %v2405_v56 = vpack.c.bf16 %v1155_v53, %v1153_v52  ;;  %v1324_v52 = vld [vmem:[#allocation15 + $0xe8] sm:$0xff] (!%p2098_p1) }
 0x3f3   : > { %v2231_v57 = vpop.f32.mrb[0].mxu0 }
 0x3f4   : > { %v2232_v58 = vpop.f32.mrb[1].mxu0 }
 0x3f5   : > { %v2233_v59 = vadd.f32 %v2232_v58, %v2231_v57  ;;  %v2407_v57 = vpack.c.bf16 %v1160_v55, %v1158_v54  ;;  %v1157_v58 = vld [vmem:[%s3820_s24 + $0xc0] sm:$0xff] }
 0x3f6   : > { %v1319_v55 = vld [vmem:[#allocation15 + $0xc0] sm:$0xff] (!%p2098_p1) }
 0x3f7   : > { %v2234_v60 = vpop.f32.mrb[2].mxu0  ;;  %2257 = vmatprep.mubr.f32.mxu0 %v2233_v59  ;;  %v1159_v59 = vld [vmem:[%s3820_s24 + $0xd0] sm:$0xff] }
 0x3f8   : > { %v2235_v61 = vpop.f32.mrb[3].mxu0 }
 0x3f9   : > { %v2236_v62 = vadd.f32 %v2235_v61, %v2234_v60  ;;  %v2409_v60 = vpack.c.bf16 %v1159_v59, %v1157_v58  ;;  %v1162_v61 = vld [vmem:[%s3820_s24 + $0xe8] sm:$0xff] }
 0x3fa   : > { %v1332_v58 = vld [vmem:[#allocation15 + $0x128] sm:$0xff] (!%p2098_p1) }
 0x3fb   : > { %2258 = vmatmul.mubr.f32.vlgmr.msra.gmra.mrb[4].mxu0 %v2236_v62  ;;  %v1164_v62 = vld [vmem:[%s3820_s24 + $0xf8] sm:$0xff] }
 0x4ce   : > { %v2259_v63 = vpop.f32.mrb[4].mxu0 }
 0x4cf   : > { %v1014_v0 = vpop.f32.mrb[5].mxu0  ;;  %v1027_v2 = vsel %vm1023_vm0, %v2259_v63, -inf }
 0x4d0   : > { %v1024_v1 = vsel %vm1023_vm0, %v1014_v0, -inf }
 0x4d1   : > { %1025 = vmax.xlane.f32.xlu0 %v1024_v1  ;;  %v1163_v1 = vld [vmem:[%s3820_s24 + $0xf0] sm:$0xff] }
 0x4d5   : > { %1028 = vmax.xlane.f32.xlu0 %v1027_v2 }
 0x55e   : > { %v1026_v9 = vpop.xlane.xlu0 %1025 }
 0x55f   : > { %v1030_v10 = vsub.f32 %v1014_v0, %v1026_v9  ;;  %v1161_v0 = vld [vmem:[%s3820_s24 + $0xe0] sm:$0xff] }
 0x560   : > { %v2413_v2 = vpack.c.bf16 %v1163_v1, %v1161_v0  ;;  %v1340_v0 = vld [vmem:[#allocation15 + $0x168] sm:$0xff] (!%p2098_p1) }
 0x561   : > { %v1032_v11 = vmul.f32 1.442695, %v1030_v10 }
 0x562   : > { %v1029_v12 = vpop.xlane.xlu0 %1028 }
 0x563   : > { %2871 = vpow2.f32 %v1032_v11  ;;  %v1031_v13 = vsub.f32 %v2259_v63, %v1029_v12  ;;  %v2411_v63 = vpack.c.bf16 %v1164_v62, %v1162_v61  ;;  %v1127_v12 = vld [vmem:[#allocation5] sm:$0xff] }
 0x564   : > { %v1327_v61 = vld [vmem:[#allocation15 + $0x100] sm:$0xff] (!%p2098_p1) }
 0x565   : > { %v1034_v14 = vmul.f32 1.442695, %v1031_v13  ;;  %v1128_v13 = vld [vmem:[#allocation5 + $0x8] sm:$0xff]  ;;  %v1331_v62 = vld [vmem:[#allocation15 + $0x120] sm:$0xff] (!%p2098_p1) }
 0x566   : > { %v2433_v1 = vpack.c.bf16 (!%p2098_p1), %v1331_v62, %v1327_v61  ;;  %v1407_v61 = vld [vmem:[#allocation15 + $0x380] sm:$0xff] (!%p2098_p1) }
 0x567   : > { %2873 = vpow2.f32 %v1034_v14  ;;  %v1411_v62 = vld [vmem:[#allocation15 + $0x3a0] sm:$0xff] (!%p2098_p1) }
 0x56d   : > { %v2872_v15 = vpop.eup %2871 }
 0x56e   : > { %2268 = vmatprep.mubr.msk.f32.mxu1 %vm1023_vm0, %v2872_v15  ;;  %v1117_v16 = vsel %vm1023_vm0, %v2872_v15, 0.0 }
 0x56f   : > { %1118 = vadd.xlane.f32.xlu1 %v1117_v16 }
 0x571   : > { %v2874_v17 = vpop.eup %2873 }
 0x572   : > { %2269 = vmatmul.mubr.msk.f32.vlgmr.msra.gmra.mrb[0].mxu1 %vm1023_vm0, %v2874_v17  ;;  %v1120_v18 = vsel %vm1023_vm0, %v2874_v17, 0.0 }
 0x573   : > { %1121 = vadd.xlane.f32.xlu1 %v1120_v18  ;;  %2386 = vmatpush1.bf16.msra.mxu1 %v2385_v26  ;;  %v1129_v18 = vld [vmem:[#allocation5 + $0x10] sm:$0xff] }
 0x574   : > { %2388 = vmatprep.subr.bf16.mxu1 %v2387_v27  ;;  %1229 = vmatprep.mubr.f32.mxu1 %v3250_v3 }
 0x577   : > { %2390 = vmatpush1.bf16.msra.mxu1 %v2389_v32  ;;  %v1300_v32 = vld [vmem:[#allocation15 + $0x28] sm:$0xff] (!%p2098_p1) }
 0x578   : > { %2392 = vmatprep.subr.bf16.mxu1 %v2391_v33  ;;  %v2415_v34 = vpack.c.bf16 (!%p2098_p1), %v1300_v32, %v1296_v31  ;;  %v1367_v31 = vld [vmem:[#allocation15 + $0x240] sm:$0xff] (!%p2098_p1) }
 0x579   : > { %v1371_v32 = vld [vmem:[#allocation15 + $0x260] sm:$0xff] (!%p2098_p1) }
 0x57b   : > { %2394 = vmatpush1.bf16.msra.mxu1 %v2393_v38 }
 0x57c   : > { %2396 = vmatprep.subr.bf16.mxu1 %v2395_v39  ;;  %v2417_v39 = vpack.c.bf16 (!%p2098_p1), %v1299_v36, %v1295_v35  ;;  %v2453_v35 = vpack.c.bf16 (!%p2098_p1), %v1371_v32, %v1367_v31  ;;  %v1600_v31 = vld [vmem:[#allocation17 + $0x78] sm:$0xff] (!%p2098_p1) }
 0x57f   : > { %2398 = vmatpush1.bf16.msra.mxu1 %v2397_v44  ;;  %v1312_v44 = vld [vmem:[#allocation15 + $0x88] sm:$0xff] (!%p2098_p1) }
 0x580   : > { %2400 = vmatprep.subr.bf16.mxu1 %v2399_v45  ;;  %v1316_v45 = vld [vmem:[#allocation15 + $0xa8] sm:$0xff] (!%p2098_p1) }
 0x581   : > { %v2423_v48 = vpack.c.bf16 (!%p2098_p1), %v1316_v45, %v1312_v44  ;;  %v1387_v44 = vld [vmem:[#allocation15 + $0x2e0] sm:$0xff] (!%p2098_p1)  ;;  %v1392_v45 = vld [vmem:[#allocation15 + $0x308] sm:$0xff] (!%p2098_p1) }
 0x583   : > { %2402 = vmatpush1.bf16.msra.mxu1 %v2401_v50  ;;  %v1315_v50 = vld [vmem:[#allocation15 + $0xa0] sm:$0xff] (!%p2098_p1) }
 0x584   : > { %2404 = vmatprep.subr.bf16.mxu1 %v2403_v51  ;;  %v1320_v51 = vld [vmem:[#allocation15 + $0xc8] sm:$0xff] (!%p2098_p1)  ;;  %v2425_v53 = vpack.c.bf16 (!%p2098_p1), %v1315_v50, %v1311_v49  ;;  %v1391_v49 = vld [vmem:[#allocation15 + $0x300] sm:$0xff] (!%p2098_p1) }
 0x585   : > { %v2427_v54 = vpack.c.bf16 (!%p2098_p1), %v1324_v52, %v1320_v51  ;;  %v1395_v50 = vld [vmem:[#allocation15 + $0x320] sm:$0xff] (!%p2098_p1)  ;;  %v1400_v51 = vld [vmem:[#allocation15 + $0x348] sm:$0xff] (!%p2098_p1) }
 0x586   : > { %v1404_v52 = vld [vmem:[#allocation15 + $0x368] sm:$0xff] (!%p2098_p1) }
 0x587   : > { %2406 = vmatpush1.bf16.msra.mxu1 %v2405_v56  ;;  %v1323_v56 = vld [vmem:[#allocation15 + $0xe0] sm:$0xff] (!%p2098_p1) }
 0x588   : > { %2408 = vmatprep.subr.bf16.mxu1 %v2407_v57  ;;  %v1328_v57 = vld [vmem:[#allocation15 + $0x108] sm:$0xff] (!%p2098_p1)  ;;  %v2429_v59 = vpack.c.bf16 (!%p2098_p1), %v1323_v56, %v1319_v55  ;;  %v1399_v55 = vld [vmem:[#allocation15 + $0x340] sm:$0xff] (!%p2098_p1) }
 0x589   : > { %v1403_v56 = vld [vmem:[#allocation15 + $0x360] sm:$0xff] (!%p2098_p1) }
 0x58b   : > { %2410 = vmatpush1.bf16.msra.mxu1 %v2409_v60  ;;  %v2431_v60 = vpack.c.bf16 (!%p2098_p1), %v1332_v58, %v1328_v57  ;;  %v1408_v57 = vld [vmem:[#allocation15 + $0x388] sm:$0xff] (!%p2098_p1) }
 0x58c   : > { %2412 = vmatprep.subr.bf16.mxu1 %v2411_v63  ;;  %v1336_v63 = vld [vmem:[#allocation15 + $0x148] sm:$0xff] (!%p2098_p1) }
 0x58d   : > { %v1412_v58 = vld [vmem:[#allocation15 + $0x3a8] sm:$0xff] (!%p2098_p1) }
 0x58f   : > { %2414 = vmatpush1.bf16.msra.mxu1 %v2413_v2  ;;  %v2435_v2 = vpack.c.bf16 (!%p2098_p1), %v1340_v0, %v1336_v63  ;;  %v1416_v63 = vld [vmem:[#allocation15 + $0x3c8] sm:$0xff] (!%p2098_p1) }
 0x590   : > { %2416 = vmatprep.subr.bf16.mxu1 (!%p2098_p1), %v2415_v34  ;;  %v1380_v34 = vld [vmem:[#allocation15 + $0x2a8] sm:$0xff] (!%p2098_p1) }
 0x591   : > { %v1420_v0 = vld [vmem:[#allocation15 + $0x3e8] sm:$0xff] (!%p2098_p1) }
 0x5fc   : > { %v1119_v4 = vpop.xlane.xlu1 %1118 }
 0x5fd   : > { %2875 = vrcp.f32 %v1119_v4  ;;  %v1339_v4 = vld [vmem:[#allocation15 + $0x160] sm:$0xff] (!%p2098_p1) }
 0x600   : > { %v1122_v5 = vpop.xlane.xlu1 %1121 }
 0x601   : > { %2877 = vrcp.f32 %v1122_v5  ;;  %v1344_v5 = vld [vmem:[#allocation15 + $0x188] sm:$0xff] (!%p2098_p1) }
 0x607   : > { %v2876_v7 = vpop.eup %2875 }
 0x60b   : > { %v2878_v10 = vpop.eup %2877 }
 0x645   : > { %v2270_v6 = vpop.f32.mrb[0].mxu1 }
 0x646   : > { %v1108_v8 = vpop.f32.mrb[1].mxu1  ;;  %v1126_v11 = vmul.f32 %v2878_v10, %v2270_v6  ;;  %v1348_v6 = vld [vmem:[#allocation15 + $0x1a8] sm:$0xff] (!%p2098_p1)  ;;  %v1347_v10 = vld [vmem:[#allocation15 + $0x1a0] sm:$0xff] (!%p2098_p1) }
 0x647   : > { %v1125_v9 = vmul.f32 %v2876_v7, %v1108_v8  ;;  %v2439_v8 = vpack.c.bf16 (!%p2098_p1), %v1348_v6, %v1344_v5  ;;  %v1298_v5 = vld [vmem:[#allocation15 + $0x18] sm:$0xff] (!%p2098_p1) }
 0x648   : > { %v1302_v6 = vld [vmem:[#allocation15 + $0x38] sm:$0xff] (!%p2098_p1) }
 0x649   : > { %1230 = vmatmul.mubr.f32.vlgmr.msra.gmra.mrb[2].mxu1 %v1125_v9  ;;  %v1343_v9 = vld [vmem:[#allocation15 + $0x180] sm:$0xff] (!%p2098_p1) }
 0x64a   : > { %1235 = vmatprep.mubr.f32.mxu1 %v3250_v3  ;;  %2418 = vmatpush1.bf16.msra.mxu1 (!%p2098_p1), %v2417_v39  ;;  %v1335_v3 = vld [vmem:[#allocation15 + $0x140] sm:$0xff] (!%p2098_p1)  ;;  %v1384_v39 = vld [vmem:[#allocation15 + $0x2c8] sm:$0xff] (!%p2098_p1) }
 0x64b   : > { %2420 = vmatprep.subr.bf16.mxu1 (!%p2098_p1), %v2419_v43  ;;  %v2437_v7 = vpack.c.bf16 (!%p2098_p1), %v1339_v4, %v1335_v3  ;;  %v2459_v42 = vpack.c.bf16 (!%p2098_p1), %v1388_v40, %v1384_v39  ;;  %v1383_v43 = vld [vmem:[#allocation15 + $0x2c0] sm:$0xff] (!%p2098_p1) }
 0x64c   : > { %v1415_v3 = vld [vmem:[#allocation15 + $0x3c0] sm:$0xff] (!%p2098_p1) }
 0x64d   : > { %1236 = vmatmul.mubr.f32.gmra.mrb[4].mxu1 %v1126_v11  ;;  %v1352_v11 = vld [vmem:[#allocation15 + $0x1c8] sm:$0xff] (!%p2098_p1)  ;;  %v1419_v4 = vld [vmem:[#allocation15 + $0x3e0] sm:$0xff] (!%p2098_p1) }
 0x64e   : > { %2422 = vmatpush1.bf16.msra.mxu1 (!%p2098_p1), %v2421_v47  ;;  %v2461_v47 = vpack.c.bf16 (!%p2098_p1), %v1387_v44, %v1383_v43  ;;  %v1601_v40 = vld [vmem:[#allocation17 + $0x80] sm:$0xff] (!%p2098_p1)  ;;  %v1608_v43 = vld [vmem:[#allocation17 + $0xb8] sm:$0xff] (!%p2098_p1) }
 0x64f   : > { %2424 = vmatprep.subr.bf16.mxu1 (!%p2098_p1), %v2423_v48 }
 0x652   : > { %2426 = vmatpush1.bf16.msra.mxu1 (!%p2098_p1), %v2425_v53  ;;  %v2465_v53 = vpack.c.bf16 (!%p2098_p1), %v1395_v50, %v1391_v49  ;;  %v1612_v49 = vld [vmem:[#allocation17 + $0xd8] sm:$0xff] (!%p2098_p1) }
 0x653   : > { %2428 = vmatprep.subr.bf16.mxu1 (!%p2098_p1), %v2427_v54  ;;  %v2467_v54 = vpack.c.bf16 (!%p2098_p1), %v1404_v52, %v1400_v51  ;;  %v1609_v52 = vld [vmem:[#allocation17 + $0xc0] sm:$0xff] (!%p2098_p1) }
 0x656   : > { %2430 = vmatpush1.bf16.msra.mxu1 (!%p2098_p1), %v2429_v59  ;;  %v2469_v59 = vpack.c.bf16 (!%p2098_p1), %v1403_v56, %v1399_v55  ;;  %v1616_v55 = vld [vmem:[#allocation17 + $0xf8] sm:$0xff] (!%p2098_p1) }
 0x657   : > { %2432 = vmatprep.subr.bf16.mxu1 (!%p2098_p1), %v2431_v60  ;;  %v2471_v60 = vpack.c.bf16 (!%p2098_p1), %v1412_v58, %v1408_v57  ;;  %v1613_v58 = vld [vmem:[#allocation17 + $0xe0] sm:$0xff] (!%p2098_p1) }
 0x65a   : > { %2434 = vmatpush1.bf16.msra.mxu1 (!%p2098_p1), %v2433_v1  ;;  %v2473_v1 = vpack.c.bf16 (!%p2098_p1), %v1411_v62, %v1407_v61  ;;  %v1620_v61 = vld [vmem:[#allocation17 + $0x118] sm:$0xff] (!%p2098_p1) }
 0x65b   : > { %2436 = vmatprep.subr.bf16.mxu1 (!%p2098_p1), %v2435_v2  ;;  %v2475_v2 = vpack.c.bf16 (!%p2098_p1), %v1420_v0, %v1416_v63  ;;  %v1617_v0 = vld [vmem:[#allocation17 + $0x100] sm:$0xff] (!%p2098_p1) }
 0x65e   : > { %2438 = vmatpush1.bf16.msra.mxu1 (!%p2098_p1), %v2437_v7  ;;  %v2477_v7 = vpack.c.bf16 (!%p2098_p1), %v1419_v4, %v1415_v3  ;;  %v1624_v3 = vld [vmem:[#allocation17 + $0x138] sm:$0xff] (!%p2098_p1) }
 0x65f   : > { %2440 = vmatprep.subr.bf16.mxu1 (!%p2098_p1), %v2439_v8  ;;  %v2479_v8 = vpack.c.bf16 (!%p2098_p1), %v1302_v6, %v1298_v5  ;;  %v1621_v6 = vld [vmem:[#allocation17 + $0x120] sm:$0xff] (!%p2098_p1) }
 0x71c   : > { %v1231_v14 = vpop.f32.mrb[2].mxu1 }
 0x71d   : > { %v1242_v15 = vadd.f32 %v1231_v14, %v1127_v12  ;;  %v1233_v16 = vpop.f32.mrb[3].mxu1  ;;  %v1356_v12 = vld [vmem:[#allocation15 + $0x1e8] sm:$0xff] (!%p2098_p1) }
 0x71e   : > { %v1243_v17 = vadd.f32 %v1233_v16, %v1128_v13  ;;  %1253 = sbr.rel (%p2098_p1) target bundleno = 2498 (0x9c2), region = 100  ;;  %v2441_v13 = vpack.c.bf16 (!%p2098_p1), %v1347_v10, %v1343_v9  ;;  %v2443_v14 = vpack.c.bf16 (!%p2098_p1), %v1356_v12, %v1352_v11  ;;  %v1355_v16 = vld [vmem:[#allocation15 + $0x1e0] sm:$0xff] (!%p2098_p1)  ;;  %v1586_v9 = vld [vmem:[#allocation17 + $0x8] sm:$0xff] (!%p2098_p1)  ;;  %v1588_v10 = vld [vmem:[#allocation17 + $0x18] sm:$0xff] (!%p2098_p1) }
 0x71f   : > { %1246 = vst [vmem:[#allocation5] sm:$0xff] %v1242_v15  ;;  %v1351_v15 = vld [vmem:[#allocation15 + $0x1c0] sm:$0xff] (!%p2098_p1)  ;;  %v2543_v12 = vpack.c.bf16 (!%p2098_p1), %v1588_v10, %v1586_v9  ;;  %v1628_v9 = vld [vmem:[#allocation17 + $0x158] sm:$0xff] (!%p2098_p1) }
 0x720   : > { %1247 = vst [vmem:[#allocation5 + $0x8] sm:$0xff] %v1243_v17  ;;  %v1237_v20 = vpop.f32.mrb[4].mxu1  ;;  %v1360_v17 = vld [vmem:[#allocation15 + $0x208] sm:$0xff] (!%p2098_p1)  ;;  %2442 = vmatpush1.bf16.msra.mxu1 (!%p2098_p1), %v2441_v13  ;;  %v1585_v11 = vld [vmem:[#allocation17] sm:$0xff] (!%p2098_p1)  ;;  %v1587_v13 = vld [vmem:[#allocation17 + $0x10] sm:$0xff] (!%p2098_p1) }
 0x721   : > { %v1244_v21 = vadd.f32 %v1237_v20, %v1129_v18  ;;  %v1239_v22 = vpop.f32.mrb[5].mxu1  ;;  %v1364_v18 = vld [vmem:[#allocation15 + $0x228] sm:$0xff] (!%p2098_p1)  ;;  %2444 = vmatprep.subr.bf16.mxu1 (!%p2098_p1), %v2443_v14  ;;  %2544 = vmatprep.subr.bf16.mxu0 (!%p2098_p1), %v2543_v12  ;;  %v1625_v12 = vld [vmem:[#allocation17 + $0x140] sm:$0xff] (!%p2098_p1) }
 0x722   : > { %v1245_v23 = vadd.f32 %v1239_v22, %v1130_v19  ;;  %v2445_v19 = vpack.c.bf16 (!%p2098_p1), %v1355_v16, %v1351_v15  ;;  %v2447_v20 = vpack.c.bf16 (!%p2098_p1), %v1364_v18, %v1360_v17  ;;  %v1363_v22 = vld [vmem:[#allocation15 + $0x220] sm:$0xff] (!%p2098_p1)  ;;  %v1590_v14 = vld [vmem:[#allocation17 + $0x28] sm:$0xff] (!%p2098_p1)  ;;  %v1592_v15 = vld [vmem:[#allocation17 + $0x38] sm:$0xff] (!%p2098_p1)  ;;  %v2545_v16 = vpack.c.bf16 (!%p2098_p1), %v1587_v13, %v1585_v11 }
 0x723   : > { %1248 = vst [vmem:[#allocation5 + $0x10] sm:$0xff] %v1244_v21  ;;  %v1359_v21 = vld [vmem:[#allocation15 + $0x200] sm:$0xff] (!%p2098_p1)  ;;  %v2547_v17 = vpack.c.bf16 (!%p2098_p1), %v1592_v15, %v1590_v14  ;;  %v1627_v13 = vld [vmem:[#allocation17 + $0x150] sm:$0xff] (!%p2098_p1)  ;;  %v1630_v14 = vld [vmem:[#allocation17 + $0x168] sm:$0xff] (!%p2098_p1) }
 0x724   : > { %1249 = vst [vmem:[#allocation5 + $0x18] sm:$0xff] %v1245_v23  ;;  %v1368_v23 = vld [vmem:[#allocation15 + $0x248] sm:$0xff] (!%p2098_p1)  ;;  %2446 = vmatpush1.bf16.msra.mxu1 (!%p2098_p1), %v2445_v19  ;;  %v1589_v18 = vld [vmem:[#allocation17 + $0x20] sm:$0xff] (!%p2098_p1)  ;;  %v1591_v19 = vld [vmem:[#allocation17 + $0x30] sm:$0xff] (!%p2098_p1)  ;;  %2546 = vmatpush1.bf16.msra.mxu0 (!%p2098_p1), %v2545_v16 }
 0x725   : > { %2448 = vmatprep.subr.bf16.mxu1 %v2447_v20  ;;  %v1594_v20 = vld [vmem:[#allocation17 + $0x48] sm:$0xff]  ;;  %2548 = vmatprep.subr.bf16.mxu0 %v2547_v17  ;;  %v1632_v15 = vld [vmem:[#allocation17 + $0x178] sm:$0xff] }
 0x726   : > { %v3855_v24 = vld [vmem:[#allocation5] sm:$0xff] }
 0x727   : > { %v3857_v25 = vld [vmem:[#allocation5 + $0x8] sm:$0xff]  ;;  %v1258_v27 = vmul.f32 %v3855_v24, %v3855_v24 }
 0x728   : > { %v1259_v28 = vmul.f32 %v3857_v25, %v3857_v25 }
 0x72a   : > { %v3859_v26 = vld [vmem:[#allocation5 + $0x10] sm:$0xff]  ;;  %v1262_v38 = vadd.f32 %v1259_v28, %v1258_v27  ;;  %v1372_v27 = vld [vmem:[#allocation15 + $0x268] sm:$0xff]  ;;  %v2449_v28 = vpack.c.bf16 %v1363_v22, %v1359_v21  ;;  %v1596_v21 = vld [vmem:[#allocation17 + $0x58] sm:$0xff]  ;;  %v2549_v22 = vpack.c.bf16 %v1591_v19, %v1589_v18  ;;  %v2585_v18 = vpack.c.bf16 %v1627_v13, %v1625_v12 }
 0x72b   : > { %v3865_v29 = vld [vmem:[#allocation5 + $0x18] sm:$0xff]  ;;  %v1260_v30 = vmul.f32 %v3859_v26, %v3859_v26  ;;  %v1281_v19 = vlaneseq  ;;  %v1313_v12 = vld [vmem:[#allocation15 + $0x90] sm:$0xff] }
 0x72c   : > { %v1261_v33 = vmul.f32 %v3865_v29, %v3865_v29  ;;  %1263 = vadd.xlane.f32.xlu0 %v1262_v38  ;;  %2450 = vmatpush1.bf16.msra.mxu1 %v2449_v28  ;;  %v1379_v38 = vld [vmem:[#allocation15 + $0x2a0] sm:$0xff]  ;;  %v1595_v28 = vld [vmem:[#allocation17 + $0x50] sm:$0xff] }
 0x72d   : > { %v2457_v41 = vpack.c.bf16 %v1379_v38, %v1375_v37  ;;  %2550 = vmatpush1.bf16.msra.mxu0 %v2549_v22  ;;  %v1604_v37 = vld [vmem:[#allocation17 + $0x98] sm:$0xff]  ;;  %v1631_v22 = vld [vmem:[#allocation17 + $0x170] sm:$0xff] }
 0x72e   : > { %v1265_v46 = vadd.f32 %v1261_v33, %v1260_v30  ;;  %v2451_v30 = vpack.c.bf16 %v1372_v27, %v1368_v23  ;;  %v1376_v33 = vld [vmem:[#allocation15 + $0x288] sm:$0xff]  ;;  %v2551_v23 = vpack.c.bf16 %v1596_v21, %v1594_v20  ;;  %v1593_v27 = vld [vmem:[#allocation17 + $0x40] sm:$0xff]  ;;  %v2587_v20 = vpack.c.bf16 %v1632_v15, %v1630_v14  ;;  %v1317_v13 = vld [vmem:[#allocation15 + $0xb0] sm:$0xff] }
 0x72f   : > { %v2455_v36 = vpack.c.bf16 %v1380_v34, %v1376_v33  ;;  %v2553_v32 = vpack.c.bf16 %v1595_v28, %v1593_v27  ;;  %v1597_v34 = vld [vmem:[#allocation17 + $0x60] sm:$0xff]  ;;  %v1634_v27 = vld [vmem:[#allocation17 + $0x188] sm:$0xff]  ;;  %v1636_v28 = vld [vmem:[#allocation17 + $0x198] sm:$0xff] }
 0x730   : > { %1266 = vadd.xlane.f32.xlu0 %v1265_v46  ;;  %2452 = vmatprep.subr.bf16.mxu1 %v2451_v30  ;;  %v1396_v46 = vld [vmem:[#allocation15 + $0x328] sm:$0xff]  ;;  %v1629_v21 = vld [vmem:[#allocation17 + $0x160] sm:$0xff]  ;;  %v1326_v14 = vld [vmem:[#allocation15 + $0xf8] sm:$0xff] }
 0x731   : > { %2454 = vmatpush1.bf16.msra.mxu1 %v2453_v35  ;;  %v2463_v48 = vpack.c.bf16 %v1396_v46, %v1392_v45  ;;  %v1598_v30 = vld [vmem:[#allocation17 + $0x68] sm:$0xff]  ;;  %2552 = vmatprep.subr.bf16.mxu0 %v2551_v23  ;;  %v1599_v35 = vld [vmem:[#allocation17 + $0x70] sm:$0xff]  ;;  %v1605_v46 = vld [vmem:[#allocation17 + $0xa0] sm:$0xff] }
 0x732   : > { %2456 = vmatprep.subr.bf16.mxu1 %v2455_v36  ;;  %v2555_v33 = vpack.c.bf16 %v1600_v31, %v1598_v30  ;;  %v1602_v36 = vld [vmem:[#allocation17 + $0x88] sm:$0xff]  ;;  %2554 = vmatpush1.bf16.msra.mxu0 %v2553_v32  ;;  %v2557_v38 = vpack.c.bf16 %v1599_v35, %v1597_v34  ;;  %v2589_v32 = vpack.c.bf16 %v1631_v22, %v1629_v21  ;;  %v1633_v35 = vld [vmem:[#allocation17 + $0x180] sm:$0xff]  ;;  %v1329_v22 = vld [vmem:[#allocation15 + $0x110] sm:$0xff] }
 0x733   : > { %v2559_v39 = vpack.c.bf16 %v1604_v37, %v1602_v36  ;;  %v2591_v34 = vpack.c.bf16 %v1636_v28, %v1634_v27  ;;  %v1635_v36 = vld [vmem:[#allocation17 + $0x190] sm:$0xff]  ;;  %v1338_v27 = vld [vmem:[#allocation15 + $0x158] sm:$0xff] }
 0x734   : > { %2556 = vmatprep.subr.bf16.mxu0 %v2555_v33  ;;  %v1282_v33 = vshrl.u32 %v1281_v19, 7  ;;  %v1334_v19 = vld [vmem:[#allocation15 + $0x138] sm:$0xff] }
 0x735   : > { %2458 = vmatpush1.bf16.msra.mxu1 %v2457_v41  ;;  %v1603_v41 = vld [vmem:[#allocation17 + $0x90] sm:$0xff]  ;;  %v1342_v28 = vld [vmem:[#allocation15 + $0x178] sm:$0xff] }
 0x736   : > { %2460 = vmatprep.subr.bf16.mxu1 %v2459_v42  ;;  %v1606_v42 = vld [vmem:[#allocation17 + $0xa8] sm:$0xff]  ;;  %2558 = vmatpush1.bf16.msra.mxu0 %v2557_v38  ;;  %v2561_v44 = vpack.c.bf16 %v1603_v41, %v1601_v40  ;;  %v2593_v40 = vpack.c.bf16 %v1635_v36, %v1633_v35  ;;  %v1283_v41 = vsub.s32 0, %v1282_v33  ;;  %v1350_v35 = vld [vmem:[#allocation15 + $0x1b8] sm:$0xff] }
 0x737   : > { %2560 = vmatprep.subr.bf16.mxu0 %v2559_v39  ;;  %v2563_v45 = vpack.c.bf16 %v1608_v43, %v1606_v42  ;;  %v1638_v38 = vld [vmem:[#allocation17 + $0x1a8] sm:$0xff]  ;;  %v1640_v39 = vld [vmem:[#allocation17 + $0x1b8] sm:$0xff]  ;;  %v1287_v42 = vsub.s32 1, %v1282_v33  ;;  %v1341_v33 = vld [vmem:[#allocation15 + $0x170] sm:$0xff] }
 0x738   : > { %v2595_v43 = vpack.c.bf16 %v1640_v39, %v1638_v38  ;;  %v1345_v38 = vld [vmem:[#allocation15 + $0x190] sm:$0xff] }
 0x739   : > { %2462 = vmatpush1.bf16.msra.mxu1 %v2461_v47  ;;  %v1607_v47 = vld [vmem:[#allocation17 + $0xb0] sm:$0xff] }
 0x73a   : > { %2464 = vmatprep.subr.bf16.mxu1 %v2463_v48  ;;  %v1610_v48 = vld [vmem:[#allocation17 + $0xc8] sm:$0xff]  ;;  %2562 = vmatpush1.bf16.msra.mxu0 %v2561_v44  ;;  %v2565_v50 = vpack.c.bf16 %v1607_v47, %v1605_v46  ;;  %v1637_v44 = vld [vmem:[#allocation17 + $0x1a0] sm:$0xff]  ;;  %v1349_v39 = vld [vmem:[#allocation15 + $0x1b0] sm:$0xff] }
 0x73b   : > { %2564 = vmatprep.subr.bf16.mxu0 %v2563_v45  ;;  %v2567_v51 = vpack.c.bf16 %v1612_v49, %v1610_v48  ;;  %v1639_v45 = vld [vmem:[#allocation17 + $0x1b0] sm:$0xff]  ;;  %v1279_v46 = vld [vmem:[%s4060_s25] sm:$0x3]  ;;  %v1642_v47 = vld [vmem:[#allocation17 + $0x1c8] sm:$0xff] }
 0x73c   : > { %v1644_v48 = vld [vmem:[#allocation17 + $0x1d8] sm:$0xff]  ;;  %v2597_v49 = vpack.c.bf16 %v1639_v45, %v1637_v44  ;;  %v1353_v44 = vld [vmem:[#allocation15 + $0x1d0] sm:$0xff] }
 0x73d   : > { %2466 = vmatpush1.bf16.msra.mxu1 %v2465_v53  ;;  %v1611_v53 = vld [vmem:[#allocation17 + $0xd0] sm:$0xff] }
 0x73e   : > { %2468 = vmatprep.subr.bf16.mxu1 %v2467_v54  ;;  %v1614_v54 = vld [vmem:[#allocation17 + $0xe8] sm:$0xff]  ;;  %2566 = vmatpush1.bf16.msra.mxu0 %v2565_v50  ;;  %v2569_v56 = vpack.c.bf16 %v1611_v53, %v1609_v52  ;;  %v1284_v50 = vrot.slane %v1279_v46, %v1283_v41  ;;  %v2599_v52 = vpack.c.bf16 %v1644_v48, %v1642_v47  ;;  %v1641_v53 = vld [vmem:[#allocation17 + $0x1c0] sm:$0xff]  ;;  %v1358_v41 = vld [vmem:[#allocation15 + $0x1f8] sm:$0xff] }
 0x73f   : > { %2568 = vmatprep.subr.bf16.mxu0 %v2567_v51  ;;  %v2571_v57 = vpack.c.bf16 %v1616_v55, %v1614_v54  ;;  %v1288_v51 = vrot.slane %v1279_v46, %v1287_v42  ;;  %v1643_v54 = vld [vmem:[#allocation17 + $0x1d0] sm:$0xff]  ;;  %v2505_v42 = vpack.c.bf16 %v1349_v39, %v1345_v38  ;;  %v1362_v46 = vld [vmem:[#allocation15 + $0x218] sm:$0xff] }
 0x740   : > { %v1357_v45 = vld [vmem:[#allocation15 + $0x1f0] sm:$0xff]  ;;  %v1366_v47 = vld [vmem:[#allocation15 + $0x238] sm:$0xff] }
 0x741   : > { %2470 = vmatpush1.bf16.msra.mxu1 %v2469_v59  ;;  %v1615_v59 = vld [vmem:[#allocation17 + $0xf0] sm:$0xff]  ;;  %v2509_v48 = vpack.c.bf16 %v1357_v45, %v1353_v44 }
 0x742   : > { %2472 = vmatprep.subr.bf16.mxu1 %v2471_v60  ;;  %v1618_v60 = vld [vmem:[#allocation17 + $0x108] sm:$0xff]  ;;  %2570 = vmatpush1.bf16.msra.mxu0 %v2569_v56  ;;  %v2573_v62 = vpack.c.bf16 %v1615_v59, %v1613_v58  ;;  %v1297_v56 = vld [vmem:[#allocation15 + $0x10] sm:$0xff] }
 0x743   : > { %2572 = vmatprep.subr.bf16.mxu0 %v2571_v57  ;;  %v2575_v63 = vpack.c.bf16 %v1620_v61, %v1618_v60  ;;  %v1301_v57 = vld [vmem:[#allocation15 + $0x30] sm:$0xff]  ;;  %v1306_v60 = vld [vmem:[#allocation15 + $0x58] sm:$0xff] }
 0x744   : > { %v1310_v61 = vld [vmem:[#allocation15 + $0x78] sm:$0xff]  ;;  %v1647_v38 = vld [vmem:[#allocation17 + $0x1f0] sm:$0xff] }
 0x745   : > { %2474 = vmatpush1.bf16.msra.mxu1 %v2473_v1  ;;  %v1619_v1 = vld [vmem:[#allocation17 + $0x110] sm:$0xff] }
 0x746   : > { %2476 = vmatprep.subr.bf16.mxu1 %v2475_v2  ;;  %v1622_v2 = vld [vmem:[#allocation17 + $0x128] sm:$0xff]  ;;  %2574 = vmatpush1.bf16.msra.mxu0 %v2573_v62  ;;  %v2577_v4 = vpack.c.bf16 %v1619_v1, %v1617_v0  ;;  %v2601_v62 = vpack.c.bf16 %v1643_v54, %v1641_v53  ;;  %v2481_v1 = vpack.c.bf16 %v1301_v57, %v1297_v56  ;;  %v1374_v53 = vld [vmem:[#allocation15 + $0x278] sm:$0xff]  ;;  %v1369_v56 = vld [vmem:[#allocation15 + $0x250] sm:$0xff] }
 0x747   : > { %2576 = vmatprep.subr.bf16.mxu0 %v2575_v63  ;;  %v2579_v5 = vpack.c.bf16 %v1624_v3, %v1622_v2  ;;  %v2483_v3 = vpack.c.bf16 %v1310_v61, %v1306_v60  ;;  %v1373_v57 = vld [vmem:[#allocation15 + $0x270] sm:$0xff] }
 0x748   : > { %v2517_v60 = vpack.c.bf16 %v1373_v57, %v1369_v56  ;;  %v1651_v44 = vld [vmem:[#allocation17 + $0x210] sm:$0xff] }
 0x749   : > { %2478 = vmatpush1.bf16.msra.mxu1 %v2477_v7  ;;  %v1623_v7 = vld [vmem:[#allocation17 + $0x130] sm:$0xff] }
 0x74a   : > { %2480 = vmatprep.subr.bf16.mxu1 %v2479_v8  ;;  %v1626_v8 = vld [vmem:[#allocation17 + $0x148] sm:$0xff]  ;;  %2578 = vmatpush1.bf16.msra.mxu0 %v2577_v4  ;;  %v2581_v10 = vpack.c.bf16 %v1623_v7, %v1621_v6  ;;  %v1305_v4 = vld [vmem:[#allocation15 + $0x50] sm:$0xff]  ;;  %v1314_v7 = vld [vmem:[#allocation15 + $0x98] sm:$0xff] }
 0x74b   : > { %2580 = vmatprep.subr.bf16.mxu0 %v2579_v5  ;;  %v2583_v11 = vpack.c.bf16 %v1628_v9, %v1626_v8  ;;  %v1309_v5 = vld [vmem:[#allocation15 + $0x70] sm:$0xff] }
 0x74e   : > { %2582 = vmatpush1.bf16.msra.mxu0 %v2581_v10  ;;  %v2485_v10 = vpack.c.bf16 %v1309_v5, %v1305_v4  ;;  %v1385_v5 = vld [vmem:[#allocation15 + $0x2d0] sm:$0xff] }
 0x74f   : > { %2584 = vmatprep.subr.bf16.mxu0 %v2583_v11 }
 0x752   : > { %2586 = vmatpush1.bf16.msra.mxu0 %v2585_v18  ;;  %v1330_v18 = vld [vmem:[#allocation15 + $0x118] sm:$0xff] }
 0x753   : > { %2588 = vmatprep.subr.bf16.mxu0 %v2587_v20  ;;  %v2495_v21 = vpack.c.bf16 %v1334_v19, %v1330_v18  ;;  %v1414_v18 = vld [vmem:[#allocation15 + $0x3b8] sm:$0xff] }
 0x756   : > { %2590 = vmatpush1.bf16.msra.mxu0 %v2589_v32  ;;  %v1337_v32 = vld [vmem:[#allocation15 + $0x150] sm:$0xff] }
 0x757   : > { %2592 = vmatprep.subr.bf16.mxu0 %v2591_v34  ;;  %v1346_v34 = vld [vmem:[#allocation15 + $0x198] sm:$0xff]  ;;  %v2501_v36 = vpack.c.bf16 %v1341_v33, %v1337_v32  ;;  %v1421_v32 = vld [vmem:[#allocation15 + $0x3f0] sm:$0xff] }
 0x75a   : > { %2594 = vmatpush1.bf16.msra.mxu0 %v2593_v40  ;;  %v1354_v40 = vld [vmem:[#allocation15 + $0x1d8] sm:$0xff] }
 0x75b   : > { %2596 = vmatprep.subr.bf16.mxu0 %v2595_v43  ;;  %v2507_v43 = vpack.c.bf16 %v1358_v41, %v1354_v40  ;;  %v1650_v40 = vld [vmem:[#allocation17 + $0x208] sm:$0xff]  ;;  %v1652_v41 = vld [vmem:[#allocation17 + $0x218] sm:$0xff] }
 0x75e   : > { %2598 = vmatpush1.bf16.msra.mxu0 %v2597_v49  ;;  %v2511_v49 = vpack.c.bf16 %v1366_v47, %v1362_v46  ;;  %v1656_v46 = vld [vmem:[#allocation17 + $0x238] sm:$0xff] }
 0x75f   : > { %2600 = vmatprep.subr.bf16.mxu0 %v2599_v52  ;;  %v1370_v52 = vld [vmem:[#allocation15 + $0x258] sm:$0xff] }
 0x762   : > { %2602 = vmatpush1.bf16.msra.mxu0 %v2601_v62  ;;  %v1377_v62 = vld [vmem:[#allocation15 + $0x290] sm:$0xff] }
 0x7b9   : > { %v1264_v16 = vpop.xlane.xlu0 %1263 }
 0x7ba   : > { %v1269_v17 = vmul.f32 0.00390625, %v1264_v16  ;;  %v1321_v16 = vld [vmem:[#allocation15 + $0xd0] sm:$0xff] }
 0x7bc   : > { %v1271_v23 = vadd.f32 1e-05, %v1269_v17  ;;  %v1325_v17 = vld [vmem:[#allocation15 + $0xf0] sm:$0xff] }
 0x7bd   : > { %v1267_v30 = vpop.xlane.xlu0 %1266  ;;  %v2493_v20 = vpack.c.bf16 %v1325_v17, %v1321_v16  ;;  %v1405_v16 = vld [vmem:[#allocation15 + $0x370] sm:$0xff]  ;;  %v1410_v17 = vld [vmem:[#allocation15 + $0x398] sm:$0xff] }
 0x7be   : > { %2879 = vrsqrt.f32 %v1271_v23  ;;  %v1270_v31 = vmul.f32 0.00390625, %v1267_v30  ;;  %v1333_v23 = vld [vmem:[#allocation15 + $0x130] sm:$0xff] }
 0x7bf   : > { %v2497_v30 = vpack.c.bf16 %v1333_v23, %v1329_v22  ;;  %v1413_v22 = vld [vmem:[#allocation15 + $0x3b0] sm:$0xff]  ;;  %v1418_v23 = vld [vmem:[#allocation15 + $0x3d8] sm:$0xff] }
 0x7c0   : > { %v1272_v37 = vadd.f32 1e-05, %v1270_v31  ;;  %v2499_v31 = vpack.c.bf16 %v1342_v28, %v1338_v27  ;;  %v1422_v27 = vld [vmem:[#allocation15 + $0x3f8] sm:$0xff] }
 0x7c2   : > { %2881 = vrsqrt.f32 %v1272_v37  ;;  %v2503_v37 = vpack.c.bf16 %v1350_v35, %v1346_v34  ;;  %v1646_v34 = vld [vmem:[#allocation17 + $0x1e8] sm:$0xff]  ;;  %v1648_v35 = vld [vmem:[#allocation17 + $0x1f8] sm:$0xff] }
 0x7c8   : > { %v2880_v55 = vpop.eup %2879 }
 0x7c9   : > { %v1276_v58 = vmul.f32 %v2880_v55, %v3857_v25  ;;  %v1275_v59 = vmul.f32 %v2880_v55, %v3855_v24  ;;  %v1318_v24 = vld [vmem:[#allocation15 + $0xb8] sm:$0xff]  ;;  %v2515_v55 = vpack.c.bf16 %v1374_v53, %v1370_v52  ;;  %v1658_v52 = vld [vmem:[#allocation17 + $0x248] sm:$0xff] }
 0x7ca   : > { %v2487_v11 = vpack.c.bf16 %v1318_v24, %v1314_v7  ;;  %v1398_v7 = vld [vmem:[#allocation15 + $0x338] sm:$0xff] }
 0x7cb   : > { %v1292_v63 = vmul.f32 %v1288_v51, %v1276_v58  ;;  %v3876_v0 = vmul.f32 %v1284_v50, %v1275_v59  ;;  %v1378_v58 = vld [vmem:[#allocation15 + $0x298] sm:$0xff] }
 0x7cc   : > { %v2882_v2 = vpop.eup %2881  ;;  %v1382_v59 = vld [vmem:[#allocation15 + $0x2b8] sm:$0xff] }
 0x7cd   : > { %1487 = vmatprep.mubr.f32.mxu1 %v1292_v63  ;;  %v1278_v6 = vmul.f32 %v2882_v2, %v3865_v29  ;;  %v1277_v25 = vmul.f32 %v2882_v2, %v3859_v26  ;;  %v1322_v29 = vld [vmem:[#allocation15 + $0xd8] sm:$0xff]  ;;  %v2489_v26 = vpack.c.bf16 %v1317_v13, %v1313_v12  ;;  %v2519_v61 = vpack.c.bf16 %v1382_v59, %v1378_v58  ;;  %v1397_v12 = vld [vmem:[#allocation15 + $0x330] sm:$0xff] }
 0x7ce   : > { %1488 = vmatmul.mubr.f32.vlgmr.msra.gmra.mrb[0].mxu1 %v3876_v0  ;;  %v2491_v15 = vpack.c.bf16 %v1326_v14, %v1322_v29  ;;  %v1390_v2 = vld [vmem:[#allocation15 + $0x2f8] sm:$0xff] }
 0x7cf   : > { %2482 = vmatpush1.bf16.msra.mxu1 %v2481_v1  ;;  %v3881_v8 = vmul.f32 %v1288_v51, %v1278_v6  ;;  %v3883_v9 = vmul.f32 %v1284_v50, %v1277_v25  ;;  %v1361_v50 = vld [vmem:[#allocation15 + $0x210] sm:$0xff]  ;;  %v1386_v1 = vld [vmem:[#allocation15 + $0x2d8] sm:$0xff] }
 0x7d0   : > { %2484 = vmatprep.subr.bf16.mxu1 %v2483_v3  ;;  %v1365_v51 = vld [vmem:[#allocation15 + $0x230] sm:$0xff]  ;;  %v2523_v4 = vpack.c.bf16 %v1390_v2, %v1386_v1  ;;  %v1394_v25 = vld [vmem:[#allocation15 + $0x318] sm:$0xff] }
 0x7d1   : > { %1493 = vmatprep.mubr.f32.mxu1 %v3881_v8  ;;  %v2513_v54 = vpack.c.bf16 %v1365_v51, %v1361_v50  ;;  %v1389_v6 = vld [vmem:[#allocation15 + $0x2f0] sm:$0xff]  ;;  %v1402_v13 = vld [vmem:[#allocation15 + $0x358] sm:$0xff]  ;;  %v1653_v50 = vld [vmem:[#allocation17 + $0x220] sm:$0xff] }
 0x7d2   : > { %1494 = vmatmul.mubr.f32.gmra.mrb[2].mxu1 %v3883_v9  ;;  %v2525_v24 = vpack.c.bf16 %v1389_v6, %v1385_v5  ;;  %v1406_v29 = vld [vmem:[#allocation15 + $0x378] sm:$0xff]  ;;  %v1655_v51 = vld [vmem:[#allocation17 + $0x230] sm:$0xff]  ;;  %v1666_v5 = vld [vmem:[#allocation17 + $0x288] sm:$0xff] }
 0x7d3   : > { %2486 = vmatpush1.bf16.msra.mxu1 %v2485_v10  ;;  %1564 = vmatprep.mubr.f32.mxu1 %v1292_v63  ;;  %v1381_v63 = vld [vmem:[#allocation15 + $0x2b0] sm:$0xff]  ;;  %v2527_v10 = vpack.c.bf16 %v1398_v7, %v1394_v25  ;;  %v1660_v53 = vld [vmem:[#allocation17 + $0x258] sm:$0xff]  ;;  %v2613_v57 = vpack.c.bf16 %v1655_v51, %v1653_v50  ;;  %v1693_v50 = vld [vmem:[#allocation17 + $0x360] sm:$0xff] }
 0x7d4   : > { %2488 = vmatprep.subr.bf16.mxu1 %v2487_v11  ;;  %v2521_v3 = vpack.c.bf16 %v1381_v63, %v1377_v62  ;;  %v1393_v11 = vld [vmem:[#allocation15 + $0x310] sm:$0xff]  ;;  %v2615_v59 = vpack.c.bf16 %v1660_v53, %v1658_v52  ;;  %v1662_v62 = vld [vmem:[#allocation17 + $0x268] sm:$0xff]  ;;  %v1664_v63 = vld [vmem:[#allocation17 + $0x278] sm:$0xff] }
 0x7d5   : > { %v2529_v14 = vpack.c.bf16 %v1397_v12, %v1393_v11  ;;  %v2619_v2 = vpack.c.bf16 %v1664_v63, %v1662_v62  ;;  %v1668_v6 = vld [vmem:[#allocation17 + $0x298] sm:$0xff]  ;;  %v1670_v11 = vld [vmem:[#allocation17 + $0x2a8] sm:$0xff]  ;;  %v1695_v51 = vld [vmem:[#allocation17 + $0x370] sm:$0xff] }
 0x7d6   : > { %v2623_v7 = vpack.c.bf16 %v1668_v6, %v1666_v5  ;;  %v1672_v12 = vld [vmem:[#allocation17 + $0x2b8] sm:$0xff]  ;;  %v1698_v52 = vld [vmem:[#allocation17 + $0x388] sm:$0xff]  ;;  %v1701_v62 = vld [vmem:[#allocation17 + $0x3a0] sm:$0xff] }
 0x7d7   : > { %2490 = vmatpush1.bf16.msra.mxu1 %v2489_v26  ;;  %v2531_v26 = vpack.c.bf16 %v1406_v29, %v1402_v13  ;;  %v2627_v29 = vpack.c.bf16 %v1672_v12, %v1670_v11  ;;  %v1700_v53 = vld [vmem:[#allocation17 + $0x398] sm:$0xff]  ;;  %v1703_v63 = vld [vmem:[#allocation17 + $0x3b0] sm:$0xff]  ;;  %v1705_v5 = vld [vmem:[#allocation17 + $0x3c0] sm:$0xff] }
 0x7d8   : > { %2492 = vmatprep.subr.bf16.mxu1 %v2491_v15  ;;  %v1401_v15 = vld [vmem:[#allocation15 + $0x350] sm:$0xff]  ;;  %v1709_v11 = vld [vmem:[#allocation17 + $0x3e0] sm:$0xff] }
 0x7d9   : > { %v2533_v19 = vpack.c.bf16 %v1405_v16, %v1401_v15  ;;  %v1674_v15 = vld [vmem:[#allocation17 + $0x2c8] sm:$0xff]  ;;  %v1676_v16 = vld [vmem:[#allocation17 + $0x2d8] sm:$0xff]  ;;  %v1707_v6 = vld [vmem:[#allocation17 + $0x3d0] sm:$0xff] }
 0x7da   : > { %v1711_v12 = vld [vmem:[#allocation17 + $0x3f0] sm:$0xff] }
 0x7db   : > { %2494 = vmatpush1.bf16.msra.mxu1 %v2493_v20  ;;  %v2535_v20 = vpack.c.bf16 %v1414_v18, %v1410_v17  ;;  %v2631_v18 = vpack.c.bf16 %v1676_v16, %v1674_v15 }
 0x7dc   : > { %2496 = vmatprep.subr.bf16.mxu1 %v2495_v21  ;;  %v1409_v21 = vld [vmem:[#allocation15 + $0x390] sm:$0xff] }
 0x7dd   : > { %v2537_v28 = vpack.c.bf16 %v1413_v22, %v1409_v21  ;;  %v1678_v21 = vld [vmem:[#allocation17 + $0x2e8] sm:$0xff]  ;;  %v1680_v22 = vld [vmem:[#allocation17 + $0x2f8] sm:$0xff] }
 0x7df   : > { %2498 = vmatpush1.bf16.msra.mxu1 %v2497_v30  ;;  %v2539_v30 = vpack.c.bf16 %v1422_v27, %v1418_v23  ;;  %v2635_v27 = vpack.c.bf16 %v1680_v22, %v1678_v21  ;;  %v2883_v21 = vld [vmem:[#allocation5] sm:$0xff] }
 0x7e0   : > { %2500 = vmatprep.subr.bf16.mxu1 %v2499_v31  ;;  %v1417_v31 = vld [vmem:[#allocation15 + $0x3d0] sm:$0xff] }
 0x7e1   : > { %v2541_v33 = vpack.c.bf16 %v1421_v32, %v1417_v31  ;;  %v1682_v31 = vld [vmem:[#allocation17 + $0x308] sm:$0xff]  ;;  %v1684_v32 = vld [vmem:[#allocation17 + $0x318] sm:$0xff] }
 0x7e3   : > { %2502 = vmatpush1.bf16.msra.mxu1 %v2501_v36  ;;  %v2603_v36 = vpack.c.bf16 %v1648_v35, %v1646_v34  ;;  %v2639_v34 = vpack.c.bf16 %v1684_v32, %v1682_v31  ;;  %v1681_v35 = vld [vmem:[#allocation17 + $0x300] sm:$0xff]  ;;  %v2885_v31 = vld [vmem:[#allocation5 + $0x10] sm:$0xff] }
 0x7e4   : > { %2504 = vmatprep.subr.bf16.mxu1 %v2503_v37  ;;  %v1645_v37 = vld [vmem:[#allocation17 + $0x1e0] sm:$0xff] }
 0x7e5   : > { %v2605_v39 = vpack.c.bf16 %v1647_v38, %v1645_v37  ;;  %2604 = vmatprep.subr.bf16.mxu0 %v2603_v36  ;;  %v1683_v36 = vld [vmem:[#allocation17 + $0x310] sm:$0xff]  ;;  %v1686_v37 = vld [vmem:[#allocation17 + $0x328] sm:$0xff]  ;;  %v1688_v38 = vld [vmem:[#allocation17 + $0x338] sm:$0xff] }
 0x7e7   : > { %2506 = vmatpush1.bf16.msra.mxu1 %v2505_v42  ;;  %2606 = vmatpush1.bf16.msra.mxu0 %v2605_v39  ;;  %v2607_v42 = vpack.c.bf16 %v1652_v41, %v1650_v40  ;;  %v2641_v39 = vpack.c.bf16 %v1683_v36, %v1681_v35  ;;  %v2643_v40 = vpack.c.bf16 %v1688_v38, %v1686_v37  ;;  %v1685_v41 = vld [vmem:[#allocation17 + $0x320] sm:$0xff] }
 0x7e8   : > { %2508 = vmatprep.subr.bf16.mxu1 %v2507_v43  ;;  %v1649_v43 = vld [vmem:[#allocation17 + $0x200] sm:$0xff] }
 0x7e9   : > { %2608 = vmatprep.subr.bf16.mxu0 %v2607_v42  ;;  %v1687_v42 = vld [vmem:[#allocation17 + $0x330] sm:$0xff] }
 0x7eb   : > { %2510 = vmatpush1.bf16.msra.mxu1 %v2509_v48 }
 0x7ec   : > { %2512 = vmatprep.subr.bf16.mxu1 %v2511_v49 }
 0x7ef   : > { %2514 = vmatpush1.bf16.msra.mxu1 %v2513_v54 }
 0x7f0   : > { %2516 = vmatprep.subr.bf16.mxu1 %v2515_v55 }
 0x7f3   : > { %2518 = vmatpush1.bf16.msra.mxu1 %v2517_v60  ;;  %v1657_v60 = vld [vmem:[#allocation17 + $0x240] sm:$0xff] }
 0x7f4   : > { %2520 = vmatprep.subr.bf16.mxu1 %v2519_v61  ;;  %v1659_v61 = vld [vmem:[#allocation17 + $0x250] sm:$0xff] }
 0x7f5   : > { %v2617_v1 = vpack.c.bf16 %v1659_v61, %v1657_v60 }
 0x7f7   : > { %2522 = vmatpush1.bf16.msra.mxu1 %v2521_v3  ;;  %v1661_v3 = vld [vmem:[#allocation17 + $0x260] sm:$0xff] }
 0x7f8   : > { %2524 = vmatprep.subr.bf16.mxu1 %v2523_v4  ;;  %v1663_v4 = vld [vmem:[#allocation17 + $0x270] sm:$0xff] }
 0x7f9   : > { %v2621_v25 = vpack.c.bf16 %v1663_v4, %v1661_v3  ;;  %v2661_v3 = vpack.c.bf16 %v1703_v63, %v1701_v62 }
 0x7fb   : > { %2526 = vmatpush1.bf16.msra.mxu1 %v2525_v24  ;;  %v1665_v24 = vld [vmem:[#allocation17 + $0x280] sm:$0xff] }
 0x7fc   : > { %2528 = vmatprep.subr.bf16.mxu1 %v2527_v10  ;;  %v1667_v10 = vld [vmem:[#allocation17 + $0x290] sm:$0xff] }
 0x7fd   : > { %v2625_v13 = vpack.c.bf16 %v1667_v10, %v1665_v24  ;;  %v2665_v24 = vpack.c.bf16 %v1707_v6, %v1705_v5 }
 0x7ff   : > { %2530 = vmatpush1.bf16.msra.mxu1 %v2529_v14  ;;  %v1669_v14 = vld [vmem:[#allocation17 + $0x2a0] sm:$0xff] }
 0x800   : > { %2532 = vmatprep.subr.bf16.mxu1 %v2531_v26  ;;  %v1671_v26 = vld [vmem:[#allocation17 + $0x2b0] sm:$0xff] }
 0x801   : > { %v2629_v17 = vpack.c.bf16 %v1671_v26, %v1669_v14 }
 0x803   : > { %2534 = vmatpush1.bf16.msra.mxu1 %v2533_v19  ;;  %v1673_v19 = vld [vmem:[#allocation17 + $0x2c0] sm:$0xff] }
 0x804   : > { %2536 = vmatprep.subr.bf16.mxu1 %v2535_v20  ;;  %v1675_v20 = vld [vmem:[#allocation17 + $0x2d0] sm:$0xff] }
 0x805   : > { %v2633_v23 = vpack.c.bf16 %v1675_v20, %v1673_v19 }
 0x807   : > { %2538 = vmatpush1.bf16.msra.mxu1 %v2537_v28  ;;  %v1677_v28 = vld [vmem:[#allocation17 + $0x2e0] sm:$0xff] }
 0x808   : > { %2540 = vmatprep.subr.bf16.mxu1 %v2539_v30  ;;  %v1679_v30 = vld [vmem:[#allocation17 + $0x2f0] sm:$0xff] }
 0x80b   : > { %2542 = vmatpush1.bf16.msra.mxu1 %v2541_v33  ;;  %v2637_v33 = vpack.c.bf16 %v1679_v30, %v1677_v28 }
 0x80e   : > { %1565 = vmatmul.mubr.f32.vlgmr.msra.gmra.mrb[4].mxu1 %v3876_v0  ;;  %v1654_v0 = vld [vmem:[#allocation17 + $0x228] sm:$0xff] }
 0x80f   : > { %1570 = vmatprep.mubr.f32.mxu1 %v3881_v8  ;;  %v2611_v49 = vpack.c.bf16 %v1656_v46, %v1654_v0  ;;  %v1689_v46 = vld [vmem:[#allocation17 + $0x340] sm:$0xff] }
 0x812   : > { %1571 = vmatmul.mubr.f32.gmra.mrb[6].mxu1 %v3883_v9  ;;  %v2609_v9 = vpack.c.bf16 %v1651_v44, %v1649_v43  ;;  %v1690_v43 = vld [vmem:[#allocation17 + $0x348] sm:$0xff]  ;;  %v1692_v44 = vld [vmem:[#allocation17 + $0x358] sm:$0xff] }
 0x813   : > { %v2647_v0 = vpack.c.bf16 %v1692_v44, %v1690_v43 }
 0x8a1   : > { %v1489_v45 = vpop.f32.mrb[0].mxu1 }
 0x8a2   : > { %v1491_v8 = vpop.f32.mrb[1].mxu1  ;;  %v1577_v48 = vmax.f32 %v1489_v45, 0.0  ;;  %v2645_v45 = vpack.c.bf16 %v1687_v42, %v1685_v41 }
 0x8a3   : > { %v1578_v47 = vmax.f32 %v1491_v8, 0.0  ;;  %v1691_v8 = vld [vmem:[#allocation17 + $0x350] sm:$0xff] }
 0x8a5   : > { %1777 = vmatprep.mubr.f32.mxu0 %v1578_v47  ;;  %v1495_v54 = vpop.f32.mrb[2].mxu1  ;;  %v1694_v47 = vld [vmem:[#allocation17 + $0x368] sm:$0xff] }
 0x8a6   : > { %1778 = vmatmul.mubr.f32.vlgmr.msra.gmra.mrb[0].mxu0 %v1577_v48  ;;  %v1581_v55 = vmax.f32 %v1495_v54, 0.0  ;;  %v1497_v56 = vpop.f32.mrb[3].mxu1  ;;  %v2649_v48 = vpack.c.bf16 %v1691_v8, %v1689_v46  ;;  %v2653_v54 = vpack.c.bf16 %v1695_v51, %v1693_v50 }
 0x8a7   : > { %2610 = vmatpush1.bf16.msra.mxu0 %v2609_v9  ;;  %v1582_v58 = vmax.f32 %v1497_v56, 0.0  ;;  %v1696_v9 = vld [vmem:[#allocation17 + $0x378] sm:$0xff]  ;;  %v1697_v56 = vld [vmem:[#allocation17 + $0x380] sm:$0xff] }
 0x8a8   : > { %2612 = vmatprep.subr.bf16.mxu0 %v2611_v49  ;;  %v2651_v49 = vpack.c.bf16 %v1696_v9, %v1694_v47 }
 0x8a9   : > { %1783 = vmatprep.mubr.f32.mxu0 %v1582_v58  ;;  %v1702_v58 = vld [vmem:[#allocation17 + $0x3a8] sm:$0xff] }
 0x8aa   : > { %1784 = vmatmul.mubr.f32.gmra.mrb[2].mxu0 %v1581_v55  ;;  %v2655_v55 = vpack.c.bf16 %v1700_v53, %v1698_v52 }
 0x8ab   : > { %2614 = vmatpush1.bf16.msra.mxu0 %v2613_v57  ;;  %v1699_v57 = vld [vmem:[#allocation17 + $0x390] sm:$0xff] }
 0x8ac   : > { %2616 = vmatprep.subr.bf16.mxu0 %v2615_v59  ;;  %v1704_v59 = vld [vmem:[#allocation17 + $0x3b8] sm:$0xff]  ;;  %v2657_v60 = vpack.c.bf16 %v1699_v57, %v1697_v56 }
 0x8ad   : > { %v2659_v61 = vpack.c.bf16 %v1704_v59, %v1702_v58 }
 0x8af   : > { %2618 = vmatpush1.bf16.msra.mxu0 %v2617_v1  ;;  %v1706_v1 = vld [vmem:[#allocation17 + $0x3c8] sm:$0xff] }
 0x8b0   : > { %2620 = vmatprep.subr.bf16.mxu0 %v2619_v2  ;;  %v1708_v2 = vld [vmem:[#allocation17 + $0x3d8] sm:$0xff] }
 0x8b1   : > { %v2663_v4 = vpack.c.bf16 %v1708_v2, %v1706_v1 }
 0x8b3   : > { %2622 = vmatpush1.bf16.msra.mxu0 %v2621_v25  ;;  %v1710_v25 = vld [vmem:[#allocation17 + $0x3e8] sm:$0xff] }
 0x8b4   : > { %2624 = vmatprep.subr.bf16.mxu0 %v2623_v7  ;;  %v1712_v7 = vld [vmem:[#allocation17 + $0x3f8] sm:$0xff] }
 0x8b5   : > { %v2667_v10 = vpack.c.bf16 %v1712_v7, %v1710_v25 }
 0x8b7   : > { %2626 = vmatpush1.bf16.msra.mxu0 %v2625_v13  ;;  %v2669_v13 = vpack.c.bf16 %v1711_v12, %v1709_v11 }
 0x8b8   : > { %2628 = vmatprep.subr.bf16.mxu0 %v2627_v29 }
 0x8bb   : > { %2630 = vmatpush1.bf16.msra.mxu0 %v2629_v17 }
 0x8bc   : > { %2632 = vmatprep.subr.bf16.mxu0 %v2631_v18 }
 0x8bf   : > { %2634 = vmatpush1.bf16.msra.mxu0 %v2633_v23 }
 0x8c0   : > { %2636 = vmatprep.subr.bf16.mxu0 %v2635_v27  ;;  %v2884_v27 = vld [vmem:[#allocation5 + $0x8] sm:$0xff] }
 0x8c3   : > { %2638 = vmatpush1.bf16.msra.mxu0 %v2637_v33 }
 0x8c4   : > { %2640 = vmatprep.subr.bf16.mxu0 %v2639_v34  ;;  %v2886_v34 = vld [vmem:[#allocation5 + $0x18] sm:$0xff] }
 0x8c7   : > { %2642 = vmatpush1.bf16.msra.mxu0 %v2641_v39 }
 0x8c8   : > { %2644 = vmatprep.subr.bf16.mxu0 %v2643_v40 }
 0x8cb   : > { %2646 = vmatpush1.bf16.msra.mxu0 %v2645_v45 }
 0x8cc   : > { %2648 = vmatprep.subr.bf16.mxu0 %v2647_v0 }
 0x8cf   : > { %2650 = vmatpush1.bf16.msra.mxu0 %v2649_v48 }
 0x8d0   : > { %2652 = vmatprep.subr.bf16.mxu0 %v2651_v49 }
 0x8d3   : > { %2654 = vmatpush1.bf16.msra.mxu0 %v2653_v54 }
 0x8d4   : > { %2656 = vmatprep.subr.bf16.mxu0 %v2655_v55 }
 0x8d7   : > { %2658 = vmatpush1.bf16.msra.mxu0 %v2657_v60 }
 0x8d8   : > { %2660 = vmatprep.subr.bf16.mxu0 %v2659_v61 }
 0x8db   : > { %2662 = vmatpush1.bf16.msra.mxu0 %v2661_v3 }
 0x8dc   : > { %2664 = vmatprep.subr.bf16.mxu0 %v2663_v4 }
 0x8df   : > { %2666 = vmatpush1.bf16.msra.mxu0 %v2665_v24 }
 0x8e0   : > { %2668 = vmatprep.subr.bf16.mxu0 %v2667_v10 }
 0x8e1   : > { %v1566_v29 = vpop.f32.mrb[4].mxu1 }
 0x8e2   : > { %v1568_v14 = vpop.f32.mrb[5].mxu1  ;;  %v1579_v15 = vmax.f32 %v1566_v29, 0.0 }
 0x8e3   : > { %v1580_v26 = vmax.f32 %v1568_v14, 0.0  ;;  %2670 = vmatpush1.bf16.msra.mxu0 %v2669_v13 }
 0x8e5   : > { %v1572_v16 = vpop.f32.mrb[6].mxu1  ;;  %1854 = vmatprep.mubr.f32.mxu0 %v1580_v26 }
 0x8e6   : > { %v1574_v17 = vpop.f32.mrb[7].mxu1  ;;  %1855 = vmatmul.mubr.f32.vlgmr.msra.gmra.mrb[0].mxu0 %v1579_v15  ;;  %v1583_v19 = vmax.f32 %v1572_v16, 0.0 }
 0x8e7   : > { %v1584_v18 = vmax.f32 %v1574_v17, 0.0 }
 0x8e9   : > { %1860 = vmatprep.mubr.f32.mxu0 %v1584_v18 }
 0x8ea   : > { %1861 = vmatmul.mubr.f32.gmra.mrb[2].mxu0 %v1583_v19 }
 0x9b9   : > { %v1856_v20 = vpop.f32.mrb[0].mxu0 }
 0x9ba   : > { %v1867_v22 = vadd.f32 %v2883_v21, %v1856_v20  ;;  %v1858_v23 = vpop.f32.mrb[1].mxu0 }
 0x9bb   : > { %v1868_v28 = vadd.f32 %v2884_v27, %v1858_v23 }
 0x9bc   : > { %1871 = vst [vmem:[%s3677_s0] sm:$0xff] %v1867_v22 }
 0x9bd   : > { %1872 = vst [vmem:[%s3677_s0 + $0x8] sm:$0xff] %v1868_v28  ;;  %v1862_v30 = vpop.f32.mrb[2].mxu0 }
 0x9be   : > { %v1869_v32 = vadd.f32 %v2885_v31, %v1862_v30  ;;  %v1864_v33 = vpop.f32.mrb[3].mxu0 }
 0x9bf   : > { %v1870_v35 = vadd.f32 %v2886_v34, %v1864_v33 }
 0x9c0   : > { %1873 = vst [vmem:[%s3677_s0 + $0x10] sm:$0xff] %v1869_v32 }
 0x9c1   : > { %1874 = vst [vmem:[%s3677_s0 + $0x18] sm:$0xff] %v1870_v35 }
 0x9c2 PF: > { %s4061_s3 = sld [smem:[#allocation27_spill]]  ;;  %s4062_s4 = sld [smem:[#allocation28_spill]] }
 0x9c3   : > { %s1892_s17 = sshll.u32 %s3677_s0, 4  ;;  %s4064_s24 = sld [smem:[#allocation40_spill]]  ;;  %s3897_s17 = int_to_ptr.vmem [resolvable:$true] %s1892_s17 }
 0x9c4   : > { %s3906_s26 = scalar_lea.sflag [#allocation8], %s456_s22  ;;  %s3085_s25 = scalar_lea.vmem %s3897_s17, 512 }
 0x9c5   : > { %p3086_p6 = scmp.ne.s32.totalorder %s3897_s17, %s3085_s25  ;;  %p4065_p3 = scmp.ne.s32.totalorder %s4042_s9, 0 }
 0x9c6   : > { %s3251_s0 = smov [#allocation18]  }
 0x9c7   : > { %p3087_p9 = pnand %p3086_p6, %p4065_p3 }
 0x9c8   : > { %s2110_s15 = sshll.u32 %s4061_s3, 2  ;;  %s2102_s27 = sshll.u32 %s4062_s4, 3 }
 0x9c9   : > { %s1889_s12 = sadd.s32 %s2110_s15, %s2102_s27  ;;  %p3088_p0 = pneg %p3087_p9 }
 0x9ca   : > { %s2103_s6 = sshll.u32 %s1889_s12, 7  ;;  %s3089_s3 = sshll.u32 %s3251_s0, 4  ;;  %s3090_s3 = int_to_ptr.vmem [resolvable:$false] %s3089_s3 }
 0x9cb   : > { %s3902_s23 = scalar_lea.hbm %s4064_s24, %s2103_s6  ;;  %s3091_s4 = scalar_lea.vmem %s3090_s3, 1024 }
 0x9cc   : > { %p3092_p10 = scmp.lt.s32.totalorder %s3897_s17, %s3090_s3  ;;  %p3093_p12 = scmp.lt.s32.totalorder %s3091_s4, %s3085_s25 }
 0x9ce   : > { %p3094_p7 = por %p3093_p12, %p3092_p10 }
 0x9d0   : > { %p3095_p11 = pnand %p3094_p7, %p3088_p0 }
 0x9d2   : > { %3098 = shalt.err (!%p3095_p11)
}
 0x9d3   : > { %s3099_s22 = scalar_lea.hbm %s3902_s23, 512  ;;  %s3103_s27 = scalar_lea.hbm %s4064_s24, 2048 }
 0x9d4   : > { %p3100_p5 = scmp.ne.s32.totalorder %s3902_s23, %s3099_s22  ;;  %p3104_p4 = scmp.lt.u32.totalorder %s3902_s23, %s4064_s24 }
 0x9d5   : > { %p3105_p13 = scmp.lt.u32.totalorder %s3103_s27, %s3099_s22  ;;  %p3107_p6 = scmp.lt.u32.totalorder %s3099_s22, %s3902_s23 }
 0x9d6   : > { %p3101_p8 = pnand %p3100_p5, %p4065_p3 }
 0x9d7   : > { %p3106_p1 = por %p3105_p13, %p3104_p4 }
 0x9d8   : > { %p3102_p2 = pneg %p3101_p8 }
 0x9d9   : > { %p3108_p9 = por %p3107_p6, %p3106_p1 }
 0x9db   : > { %p3109_p0 = pnand %p3108_p9, %p3102_p2 }
 0x9dd   : > { %3112 = shalt.err (!%p3109_p0)
}
 0x9de   : > { %s3252_s8 = smov 256   ;;  %s3253_s16 = smov 16  }
 0x9df   : > { %2701 = dma.vmem_to_hbm [thread:$0]  (%p4065_p3), %s3897_s17, 512, %s3902_s23, %s3906_s26, %s3252_s8, %s3252_s8, %s3253_s16  }
 0x9e0 PF: > { %s4066_s25 = sld [smem:[#allocation24_spill]]  ;;  %p2743_p10 = scmp.ge.s32.totalorder %s3235_s21, 2 }
 0x9e1   : > { %p4067_p12 = scmp.ne.s32.totalorder %s4043_s1, 0 }
 0x9e3   : > { %p2727_p7 = pnand %p2743_p10, %p4067_p12 }
 0x9e6   : > { %s1907_s0 = sand.u32 1, %s4066_s25  }
 0x9e7   : > { %s1908_s3 = scalar_lea.sflag [#allocation8], %s1907_s0 }
 0x9e8   : > { %3182 = dma.done.wait (!%p2727_p7), %s1908_s3, 512  }
 0x9e9   : > { %3184 = vsyncadd (!%p2727_p7), %s1908_s3, 4294966784  ;;  %s28_s21 = sadd.s32 1, %s3235_s21   ;;  %s4069_s22 = sld [smem:[#allocation25_spill]] }
 0x9ea   : > { %p3935_p11 = scmp.ge.s32.totalorder %s28_s21, 10   ;;  %s4070_s9 = smov %s3602_s30 }
 0x9eb   : > { %s4071_s1 = smov %s4089_s10  ;;  %s4073_s10 = smov %s3195_s11 }
 0x9ec   : > { %s4074_s11 = smov %s4070_s9  ;;  %s4075_s12 = smov %s3203_s13 }
 0x9ed   : > { %s4076_s13 = smov %s3207_s14  ;;  %s4077_s14 = smov %s3599_s2 }
 0x9ee   : > { %s4078_s15 = smov %s3223_s18  ;;  %s4079_s16 = smov %s3227_s19 }
 0x9ef   : > { %s4072_s30 = smov %s4069_s22  ;;  %s4080_s17 = smov %s3231_s20 }
 0x9f0   : > { %s4081_s18 = smov %s4085_s28  ;;  %s4082_s19 = smov %s4071_s1 }
 0x9f1   : > { %s4083_s20 = smov %s4093_s29  ;;  %27 = sbr.rel (!%p3935_p11) target bundleno = 24 (0x18), region = 151 }
 0x9f8   :  { %1913 = vsyncpa [#allocation7], 1 }
 0x9f9   :  { %1915 = vsyncpa [#allocation7 + $0x1], 1 }
 0x9fa   :  { %1916 = vsyncpa [#allocation10], 1 }
 0x9fb   :  { %1917 = vsyncpa [#allocation13], 1 }
 0x9fc   :  { %1918 = vsyncpa [#allocation16], 1 }
 0x9fd   :  { %1919 = vsyncpa [#allocation8], 1 }
 0x9fe   :  { %1921 = vsyncpa [#allocation8 + $0x1], 1 }

</bundles_post_ra>
